<compile_context>
chip_gen: v7x
topology: tpu7x:2x2x1
jax: 0.10.0
libtpu: 0.0.40
codegen_flags: <defaults>
</compile_context>

<pallas_src>
import jax
import jax.numpy as jnp
import numpy as np
from jax.experimental import pallas as pl
from jax.experimental.pallas import tpu as pltpu


def _realnvp_kernel(invt_ref, mask_ref, imask_ref,
                    w1_ref, b1_ref, w2_ref, b2_ref, w3_ref, b3_ref,
                    x_ref, y_ref, ldj_ref):
    L, _, D = mask_ref.shape
    x = x_ref[...].astype(jnp.float32)                     # (B, D)
    ldj = jnp.zeros((x.shape[0], 1), jnp.float32)          # (B, 1)

    # Static, fully unrolled layer loop: weights stay resident in VMEM,
    # x is carried as a value (no scratch stores/loads between layers).
    for l in range(L):
        mask = mask_ref[l]        # (1, D)
        imask = imask_ref[l]      # (1, D) == 1 - mask, precomputed on host
        inv_t = invt_ref[l]       # scalar (SMEM)

        x_m = x * mask

        # Fused s/t MLP: fc1 concatenated along out dim, fc2/fc3 block-diagonal.
        h1 = jnp.maximum(
            jnp.dot(x_m, w1_ref[l], preferred_element_type=jnp.float32)
            + b1_ref[l], 0.0)                               # (B, 2H)
        h2 = jnp.maximum(
            jnp.dot(h1, w2_ref[l], preferred_element_type=jnp.float32)
            + b2_ref[l], 0.0)                               # (B, 2H)
        st = (jnp.dot(h2, w3_ref[l], preferred_element_type=jnp.float32)
              + b3_ref[l])                                  # (B, 2D) = [s_pre | t]

        s_out = jnp.tanh(st[:, :D]) * inv_t                 # (B, D)
        t_out = st[:, D:]                                   # (B, D)

        # layer_reg is None -> z = 1
        # TODO(synk): layer_reg branch (Gaussian noise on t_out) not implemented.
        x = x_m + imask * (x * jnp.exp(s_out) + t_out)
        ldj = ldj + jnp.sum(s_out, axis=1, keepdims=True)

    y_ref[...] = x.astype(y_ref.dtype)
    ldj_ref[...] = ldj


def realnvp_forward(x, masks, inv_ts, params):
    """x: (B, D) f32. masks: (L, D). inv_ts: (L,). params: dict of stacked per-layer weights."""
    B, D = x.shape
    L, H = params["bs1"].shape

    # --- host-side packing: fuse s/t MLPs into one block-diagonal MLP ---
    w1 = jnp.concatenate([params["ws1"], params["wt1"]], axis=-1)            # (L, D, 2H)
    b1 = jnp.concatenate([params["bs1"], params["bt1"]], axis=-1)            # (L, 2H)
    w2 = jnp.zeros((L, 2 * H, 2 * H), jnp.float32)
    w2 = w2.at[:, :H, :H].set(params["ws2"]).at[:, H:, H:].set(params["wt2"])  # (L, 2H, 2H)
    b2 = jnp.concatenate([params["bs2"], params["bt2"]], axis=-1)            # (L, 2H)
    w3 = jnp.zeros((L, 2 * H, 2 * D), jnp.float32)
    w3 = w3.at[:, :H, :D].set(params["ws3"]).at[:, H:, D:].set(params["wt3"])  # (L, 2H, 2D)
    b3 = jnp.concatenate([params["bs3"], params["bt3"]], axis=-1)            # (L, 2D)

    masks3 = masks.reshape(L, 1, D).astype(jnp.float32)
    imasks3 = (1.0 - masks).reshape(L, 1, D).astype(jnp.float32)

    vmem = pl.BlockSpec(memory_space=pltpu.MemorySpace.VMEM)
    smem = pl.BlockSpec(memory_space=pltpu.MemorySpace.SMEM)

    y, ldj = pl.pallas_call(
        _realnvp_kernel,
        out_shape=(
            jax.ShapeDtypeStruct((B, D), jnp.float32),
            jax.ShapeDtypeStruct((B, 1), jnp.float32),
        ),
        in_specs=[smem] + [vmem] * 9,
        out_specs=(vmem, vmem),
    )(
        inv_ts.astype(jnp.float32),
        masks3, imasks3,
        w1, b1.reshape(L, 1, 2 * H),
        w2, b2.reshape(L, 1, 2 * H),
        w3, b3.reshape(L, 1, 2 * D),
        x.astype(jnp.float32),
    )
    return y, ldj[:, 0]   # match PyTorch: ldj_sum has shape (B,)


def realnvp_reference(x, masks, inv_ts, params):
    """Pure-JAX reference mirroring CouplingLayer.forward / RealNVP.forward."""
    ldj_sum = jnp.zeros((x.shape[0],), jnp.float32)
    L = masks.shape[0]
    for l in range(L):
        m = masks[l]
        x_m = x * m

        def mlp(w1, b1, w2, b2, w3, b3):
            h1 = jax.nn.relu(x_m @ w1 + b1)
            h2 = jax.nn.relu(h1 @ w2 + b2)
            return h2 @ w3 + b3

        s = jnp.tanh(mlp(params["ws1"][l], params["bs1"][l],
                         params["ws2"][l], params["bs2"][l],
                         params["ws3"][l], params["bs3"][l])) * inv_ts[l]
        t_out = mlp(params["wt1"][l], params["bt1"][l],
                    params["wt2"][l], params["bt2"][l],
                    params["wt3"][l], params["bt3"][l])
        x = x_m + (1.0 - m) * (x * jnp.exp(s) + t_out)
        ldj_sum = ldj_sum + jnp.sum(s, axis=1)
    return x, ldj_sum


if __name__ == "__main__":
    B, D, H, L = 8, 8, 32, 6          # batch, input_dim=output_dim, hid_dim, n_layers
    t_first = 2.0                      # `t` of the first coupling layer; others default to 1

    key = jax.random.PRNGKey(0)
    keys = jax.random.split(key, 13)

    # Deterministic synthetic parameters (stacked over layers, pre-transposed (in, out)).
    scale = 0.1
    params = {
        "ws1": scale * jax.random.normal(keys[0], (L, D, H), jnp.float32),
        "bs1": scale * jax.random.normal(keys[1], (L, H), jnp.float32),
        "ws2": scale * jax.random.normal(keys[2], (L, H, H), jnp.float32),
        "bs2": scale * jax.random.normal(keys[3], (L, H), jnp.float32),
        "ws3": scale * jax.random.normal(keys[4], (L, H, D), jnp.float32),
        "bs3": scale * jax.random.normal(keys[5], (L, D), jnp.float32),
        "wt1": scale * jax.random.normal(keys[6], (L, D, H), jnp.float32),
        "bt1": scale * jax.random.normal(keys[7], (L, H), jnp.float32),
        "wt2": scale * jax.random.normal(keys[8], (L, H, H), jnp.float32),
        "bt2": scale * jax.random.normal(keys[9], (L, H), jnp.float32),
        "wt3": scale * jax.random.normal(keys[10], (L, H, D), jnp.float32),
        "bt3": scale * jax.random.normal(keys[11], (L, D), jnp.float32),
    }

    # Alternating binary masks exactly as RealNVP.__init__ builds them:
    # [m0, 1-m0, m0, 1-m0, m0, 1-m0]
    m0 = (jnp.arange(D) % 2).astype(jnp.float32)
    masks = jnp.stack([m0 if (l % 2 == 0) else 1.0 - m0 for l in range(L)])
    inv_ts = jnp.array([1.0 / t_first] + [1.0] * (L - 1), jnp.float32)

    x = jax.random.normal(keys[12], (B, D), jnp.float32)

    y, ldj = realnvp_forward(x, masks, inv_ts, params)
    jax.block_until_ready((y, ldj))

    y_ref, ldj_ref = realnvp_reference(x, masks, inv_ts, params)
    np.testing.assert_allclose(np.asarray(y), np.asarray(y_ref), rtol=1e-5, atol=1e-5)
    np.testing.assert_allclose(np.asarray(ldj), np.asarray(ldj_ref), rtol=1e-5, atol=1e-5)

    print("KERNEL_OK")
</pallas_src>

<mosaic_0001>
module attributes {stable_mosaic.version = 11 : i64} {
  func.func @_realnvp_kernel(%arg0: memref<6xf32, #tpu.memory_space<smem>>, %arg1: memref<6x1x8xf32, #tpu.memory_space<vmem>>, %arg2: memref<6x1x8xf32, #tpu.memory_space<vmem>>, %arg3: memref<6x8x64xf32, #tpu.memory_space<vmem>>, %arg4: memref<6x1x64xf32, #tpu.memory_space<vmem>>, %arg5: memref<6x64x64xf32, #tpu.memory_space<vmem>>, %arg6: memref<6x1x64xf32, #tpu.memory_space<vmem>>, %arg7: memref<6x64x16xf32, #tpu.memory_space<vmem>>, %arg8: memref<6x1x16xf32, #tpu.memory_space<vmem>>, %arg9: memref<8x8xf32, #tpu.memory_space<vmem>>, %arg10: memref<8x8xf32, #tpu.memory_space<vmem>>, %arg11: memref<8x1xf32, #tpu.memory_space<vmem>>) attributes {dimension_semantics = [], scalar_prefetch = 0 : i64, scratch_operands = 0 : i64, tpu.core_type = #tpu.core_type<tc>} {
    %c0 = arith.constant 0 : index
    %c0_0 = arith.constant 0 : index
    %0 = vector.load %arg9[%c0, %c0_0] : memref<8x8xf32, #tpu.memory_space<vmem>>, vector<8x8xf32>
    %cst = arith.constant 0.000000e+00 : f32
    %1 = vector.broadcast %cst : f32 to vector<8x1xf32>
    %c0_1 = arith.constant 0 : index
    %c0_2 = arith.constant 0 : index
    %c0_3 = arith.constant 0 : index
    %2 = vector.load %arg1[%c0_1, %c0_2, %c0_3] : memref<6x1x8xf32, #tpu.memory_space<vmem>>, vector<1x1x8xf32>
    %3 = vector.shape_cast %2 : vector<1x1x8xf32> to vector<1x8xf32>
    %c0_4 = arith.constant 0 : index
    %c0_5 = arith.constant 0 : index
    %c0_6 = arith.constant 0 : index
    %4 = vector.load %arg2[%c0_4, %c0_5, %c0_6] : memref<6x1x8xf32, #tpu.memory_space<vmem>>, vector<1x1x8xf32>
    %5 = vector.shape_cast %4 : vector<1x1x8xf32> to vector<1x8xf32>
    %c0_7 = arith.constant 0 : index
    %6 = memref.load %arg0[%c0_7] : memref<6xf32, #tpu.memory_space<smem>>
    %7 = vector.broadcast %3 : vector<1x8xf32> to vector<8x8xf32>
    %8 = arith.mulf %0, %7 : vector<8x8xf32>
    %c0_8 = arith.constant 0 : index
    %c0_9 = arith.constant 0 : index
    %c0_10 = arith.constant 0 : index
    %9 = vector.load %arg3[%c0_8, %c0_9, %c0_10] : memref<6x8x64xf32, #tpu.memory_space<vmem>>, vector<1x8x64xf32>
    %10 = vector.shape_cast %9 : vector<1x8x64xf32> to vector<8x64xf32>
    %cst_11 = arith.constant dense<0.000000e+00> : vector<8x64xf32>
    %11 = tpu.matmul %8, %10, %cst_11 {dimension_numbers = #tpu.dot_dimension_numbers<[1], [0], [0], [1], [0, 0, 1, 1], [], []>} : vector<8x8xf32>, vector<8x64xf32>, vector<8x64xf32> -> vector<8x64xf32>
    %c0_12 = arith.constant 0 : index
    %c0_13 = arith.constant 0 : index
    %c0_14 = arith.constant 0 : index
    %12 = vector.load %arg4[%c0_12, %c0_13, %c0_14] : memref<6x1x64xf32, #tpu.memory_space<vmem>>, vector<1x1x64xf32>
    %13 = vector.shape_cast %12 : vector<1x1x64xf32> to vector<1x64xf32>
    %14 = vector.broadcast %13 : vector<1x64xf32> to vector<8x64xf32>
    %15 = arith.addf %11, %14 : vector<8x64xf32>
    %cst_15 = arith.constant 0.000000e+00 : f32
    %16 = vector.broadcast %cst_15 : f32 to vector<8x64xf32>
    %17 = arith.maximumf %15, %16 : vector<8x64xf32>
    %c0_16 = arith.constant 0 : index
    %c0_17 = arith.constant 0 : index
    %c0_18 = arith.constant 0 : index
    %18 = vector.load %arg5[%c0_16, %c0_17, %c0_18] : memref<6x64x64xf32, #tpu.memory_space<vmem>>, vector<1x64x64xf32>
    %19 = vector.shape_cast %18 : vector<1x64x64xf32> to vector<64x64xf32>
    %cst_19 = arith.constant dense<0.000000e+00> : vector<8x64xf32>
    %20 = tpu.matmul %17, %19, %cst_19 {dimension_numbers = #tpu.dot_dimension_numbers<[1], [0], [0], [1], [0, 0, 1, 1], [], []>} : vector<8x64xf32>, vector<64x64xf32>, vector<8x64xf32> -> vector<8x64xf32>
    %c0_20 = arith.constant 0 : index
    %c0_21 = arith.constant 0 : index
    %c0_22 = arith.constant 0 : index
    %21 = vector.load %arg6[%c0_20, %c0_21, %c0_22] : memref<6x1x64xf32, #tpu.memory_space<vmem>>, vector<1x1x64xf32>
    %22 = vector.shape_cast %21 : vector<1x1x64xf32> to vector<1x64xf32>
    %23 = vector.broadcast %22 : vector<1x64xf32> to vector<8x64xf32>
    %24 = arith.addf %20, %23 : vector<8x64xf32>
    %cst_23 = arith.constant 0.000000e+00 : f32
    %25 = vector.broadcast %cst_23 : f32 to vector<8x64xf32>
    %26 = arith.maximumf %24, %25 : vector<8x64xf32>
    %c0_24 = arith.constant 0 : index
    %c0_25 = arith.constant 0 : index
    %c0_26 = arith.constant 0 : index
    %27 = vector.load %arg7[%c0_24, %c0_25, %c0_26] : memref<6x64x16xf32, #tpu.memory_space<vmem>>, vector<1x64x16xf32>
    %28 = vector.shape_cast %27 : vector<1x64x16xf32> to vector<64x16xf32>
    %cst_27 = arith.constant dense<0.000000e+00> : vector<8x16xf32>
    %29 = tpu.matmul %26, %28, %cst_27 {dimension_numbers = #tpu.dot_dimension_numbers<[1], [0], [0], [1], [0, 0, 1, 1], [], []>} : vector<8x64xf32>, vector<64x16xf32>, vector<8x16xf32> -> vector<8x16xf32>
    %c0_28 = arith.constant 0 : index
    %c0_29 = arith.constant 0 : index
    %c0_30 = arith.constant 0 : index
    %30 = vector.load %arg8[%c0_28, %c0_29, %c0_30] : memref<6x1x16xf32, #tpu.memory_space<vmem>>, vector<1x1x16xf32>
    %31 = vector.shape_cast %30 : vector<1x1x16xf32> to vector<1x16xf32>
    %32 = vector.broadcast %31 : vector<1x16xf32> to vector<8x16xf32>
    %33 = arith.addf %29, %32 : vector<8x16xf32>
    %34 = vector.extract_strided_slice %33 {offsets = [0, 0], sizes = [8, 8], strides = [1, 1]} : vector<8x16xf32> to vector<8x8xf32>
    %35 = math.tanh %34 : vector<8x8xf32>
    %36 = vector.broadcast %6 : f32 to vector<8x8xf32>
    %37 = arith.mulf %35, %36 : vector<8x8xf32>
    %38 = vector.extract_strided_slice %33 {offsets = [0, 8], sizes = [8, 8], strides = [1, 1]} : vector<8x16xf32> to vector<8x8xf32>
    %39 = math.exp %37 : vector<8x8xf32>
    %40 = arith.mulf %0, %39 : vector<8x8xf32>
    %41 = arith.addf %40, %38 : vector<8x8xf32>
    %42 = vector.broadcast %5 : vector<1x8xf32> to vector<8x8xf32>
    %43 = arith.mulf %42, %41 : vector<8x8xf32>
    %44 = arith.addf %8, %43 : vector<8x8xf32>
    %cst_31 = arith.constant dense<0.000000e+00> : vector<8xf32>
    %45 = vector.multi_reduction <add>, %37, %cst_31 [1] : vector<8x8xf32> to vector<8xf32>
    %46 = vector.shape_cast %45 : vector<8xf32> to vector<8x1xf32>
    %47 = arith.addf %1, %46 : vector<8x1xf32>
    %c1 = arith.constant 1 : index
    %c0_32 = arith.constant 0 : index
    %c0_33 = arith.constant 0 : index
    %48 = vector.load %arg1[%c1, %c0_32, %c0_33] : memref<6x1x8xf32, #tpu.memory_space<vmem>>, vector<1x1x8xf32>
    %49 = vector.shape_cast %48 : vector<1x1x8xf32> to vector<1x8xf32>
    %c1_34 = arith.constant 1 : index
    %c0_35 = arith.constant 0 : index
    %c0_36 = arith.constant 0 : index
    %50 = vector.load %arg2[%c1_34, %c0_35, %c0_36] : memref<6x1x8xf32, #tpu.memory_space<vmem>>, vector<1x1x8xf32>
    %51 = vector.shape_cast %50 : vector<1x1x8xf32> to vector<1x8xf32>
    %c1_37 = arith.constant 1 : index
    %52 = memref.load %arg0[%c1_37] : memref<6xf32, #tpu.memory_space<smem>>
    %53 = vector.broadcast %49 : vector<1x8xf32> to vector<8x8xf32>
    %54 = arith.mulf %44, %53 : vector<8x8xf32>
    %c1_38 = arith.constant 1 : index
    %c0_39 = arith.constant 0 : index
    %c0_40 = arith.constant 0 : index
    %55 = vector.load %arg3[%c1_38, %c0_39, %c0_40] : memref<6x8x64xf32, #tpu.memory_space<vmem>>, vector<1x8x64xf32>
    %56 = vector.shape_cast %55 : vector<1x8x64xf32> to vector<8x64xf32>
    %cst_41 = arith.constant dense<0.000000e+00> : vector<8x64xf32>
    %57 = tpu.matmul %54, %56, %cst_41 {dimension_numbers = #tpu.dot_dimension_numbers<[1], [0], [0], [1], [0, 0, 1, 1], [], []>} : vector<8x8xf32>, vector<8x64xf32>, vector<8x64xf32> -> vector<8x64xf32>
    %c1_42 = arith.constant 1 : index
    %c0_43 = arith.constant 0 : index
    %c0_44 = arith.constant 0 : index
    %58 = vector.load %arg4[%c1_42, %c0_43, %c0_44] : memref<6x1x64xf32, #tpu.memory_space<vmem>>, vector<1x1x64xf32>
    %59 = vector.shape_cast %58 : vector<1x1x64xf32> to vector<1x64xf32>
    %60 = vector.broadcast %59 : vector<1x64xf32> to vector<8x64xf32>
    %61 = arith.addf %57, %60 : vector<8x64xf32>
    %cst_45 = arith.constant 0.000000e+00 : f32
    %62 = vector.broadcast %cst_45 : f32 to vector<8x64xf32>
    %63 = arith.maximumf %61, %62 : vector<8x64xf32>
    %c1_46 = arith.constant 1 : index
    %c0_47 = arith.constant 0 : index
    %c0_48 = arith.constant 0 : index
    %64 = vector.load %arg5[%c1_46, %c0_47, %c0_48] : memref<6x64x64xf32, #tpu.memory_space<vmem>>, vector<1x64x64xf32>
    %65 = vector.shape_cast %64 : vector<1x64x64xf32> to vector<64x64xf32>
    %cst_49 = arith.constant dense<0.000000e+00> : vector<8x64xf32>
    %66 = tpu.matmul %63, %65, %cst_49 {dimension_numbers = #tpu.dot_dimension_numbers<[1], [0], [0], [1], [0, 0, 1, 1], [], []>} : vector<8x64xf32>, vector<64x64xf32>, vector<8x64xf32> -> vector<8x64xf32>
    %c1_50 = arith.constant 1 : index
    %c0_51 = arith.constant 0 : index
    %c0_52 = arith.constant 0 : index
    %67 = vector.load %arg6[%c1_50, %c0_51, %c0_52] : memref<6x1x64xf32, #tpu.memory_space<vmem>>, vector<1x1x64xf32>
    %68 = vector.shape_cast %67 : vector<1x1x64xf32> to vector<1x64xf32>
    %69 = vector.broadcast %68 : vector<1x64xf32> to vector<8x64xf32>
    %70 = arith.addf %66, %69 : vector<8x64xf32>
    %cst_53 = arith.constant 0.000000e+00 : f32
    %71 = vector.broadcast %cst_53 : f32 to vector<8x64xf32>
    %72 = arith.maximumf %70, %71 : vector<8x64xf32>
    %c1_54 = arith.constant 1 : index
    %c0_55 = arith.constant 0 : index
    %c0_56 = arith.constant 0 : index
    %73 = vector.load %arg7[%c1_54, %c0_55, %c0_56] : memref<6x64x16xf32, #tpu.memory_space<vmem>>, vector<1x64x16xf32>
    %74 = vector.shape_cast %73 : vector<1x64x16xf32> to vector<64x16xf32>
    %cst_57 = arith.constant dense<0.000000e+00> : vector<8x16xf32>
    %75 = tpu.matmul %72, %74, %cst_57 {dimension_numbers = #tpu.dot_dimension_numbers<[1], [0], [0], [1], [0, 0, 1, 1], [], []>} : vector<8x64xf32>, vector<64x16xf32>, vector<8x16xf32> -> vector<8x16xf32>
    %c1_58 = arith.constant 1 : index
    %c0_59 = arith.constant 0 : index
    %c0_60 = arith.constant 0 : index
    %76 = vector.load %arg8[%c1_58, %c0_59, %c0_60] : memref<6x1x16xf32, #tpu.memory_space<vmem>>, vector<1x1x16xf32>
    %77 = vector.shape_cast %76 : vector<1x1x16xf32> to vector<1x16xf32>
    %78 = vector.broadcast %77 : vector<1x16xf32> to vector<8x16xf32>
    %79 = arith.addf %75, %78 : vector<8x16xf32>
    %80 = vector.extract_strided_slice %79 {offsets = [0, 0], sizes = [8, 8], strides = [1, 1]} : vector<8x16xf32> to vector<8x8xf32>
    %81 = math.tanh %80 : vector<8x8xf32>
    %82 = vector.broadcast %52 : f32 to vector<8x8xf32>
    %83 = arith.mulf %81, %82 : vector<8x8xf32>
    %84 = vector.extract_strided_slice %79 {offsets = [0, 8], sizes = [8, 8], strides = [1, 1]} : vector<8x16xf32> to vector<8x8xf32>
    %85 = math.exp %83 : vector<8x8xf32>
    %86 = arith.mulf %44, %85 : vector<8x8xf32>
    %87 = arith.addf %86, %84 : vector<8x8xf32>
    %88 = vector.broadcast %51 : vector<1x8xf32> to vector<8x8xf32>
    %89 = arith.mulf %88, %87 : vector<8x8xf32>
    %90 = arith.addf %54, %89 : vector<8x8xf32>
    %cst_61 = arith.constant dense<0.000000e+00> : vector<8xf32>
    %91 = vector.multi_reduction <add>, %83, %cst_61 [1] : vector<8x8xf32> to vector<8xf32>
    %92 = vector.shape_cast %91 : vector<8xf32> to vector<8x1xf32>
    %93 = arith.addf %47, %92 : vector<8x1xf32>
    %c2 = arith.constant 2 : index
    %c0_62 = arith.constant 0 : index
    %c0_63 = arith.constant 0 : index
    %94 = vector.load %arg1[%c2, %c0_62, %c0_63] : memref<6x1x8xf32, #tpu.memory_space<vmem>>, vector<1x1x8xf32>
    %95 = vector.shape_cast %94 : vector<1x1x8xf32> to vector<1x8xf32>
    %c2_64 = arith.constant 2 : index
    %c0_65 = arith.constant 0 : index
    %c0_66 = arith.constant 0 : index
    %96 = vector.load %arg2[%c2_64, %c0_65, %c0_66] : memref<6x1x8xf32, #tpu.memory_space<vmem>>, vector<1x1x8xf32>
    %97 = vector.shape_cast %96 : vector<1x1x8xf32> to vector<1x8xf32>
    %c2_67 = arith.constant 2 : index
    %98 = memref.load %arg0[%c2_67] : memref<6xf32, #tpu.memory_space<smem>>
    %99 = vector.broadcast %95 : vector<1x8xf32> to vector<8x8xf32>
    %100 = arith.mulf %90, %99 : vector<8x8xf32>
    %c2_68 = arith.constant 2 : index
    %c0_69 = arith.constant 0 : index
    %c0_70 = arith.constant 0 : index
    %101 = vector.load %arg3[%c2_68, %c0_69, %c0_70] : memref<6x8x64xf32, #tpu.memory_space<vmem>>, vector<1x8x64xf32>
    %102 = vector.shape_cast %101 : vector<1x8x64xf32> to vector<8x64xf32>
    %cst_71 = arith.constant dense<0.000000e+00> : vector<8x64xf32>
    %103 = tpu.matmul %100, %102, %cst_71 {dimension_numbers = #tpu.dot_dimension_numbers<[1], [0], [0], [1], [0, 0, 1, 1], [], []>} : vector<8x8xf32>, vector<8x64xf32>, vector<8x64xf32> -> vector<8x64xf32>
    %c2_72 = arith.constant 2 : index
    %c0_73 = arith.constant 0 : index
    %c0_74 = arith.constant 0 : index
    %104 = vector.load %arg4[%c2_72, %c0_73, %c0_74] : memref<6x1x64xf32, #tpu.memory_space<vmem>>, vector<1x1x64xf32>
    %105 = vector.shape_cast %104 : vector<1x1x64xf32> to vector<1x64xf32>
    %106 = vector.broadcast %105 : vector<1x64xf32> to vector<8x64xf32>
    %107 = arith.addf %103, %106 : vector<8x64xf32>
    %cst_75 = arith.constant 0.000000e+00 : f32
    %108 = vector.broadcast %cst_75 : f32 to vector<8x64xf32>
    %109 = arith.maximumf %107, %108 : vector<8x64xf32>
    %c2_76 = arith.constant 2 : index
    %c0_77 = arith.constant 0 : index
    %c0_78 = arith.constant 0 : index
    %110 = vector.load %arg5[%c2_76, %c0_77, %c0_78] : memref<6x64x64xf32, #tpu.memory_space<vmem>>, vector<1x64x64xf32>
    %111 = vector.shape_cast %110 : vector<1x64x64xf32> to vector<64x64xf32>
    %cst_79 = arith.constant dense<0.000000e+00> : vector<8x64xf32>
    %112 = tpu.matmul %109, %111, %cst_79 {dimension_numbers = #tpu.dot_dimension_numbers<[1], [0], [0], [1], [0, 0, 1, 1], [], []>} : vector<8x64xf32>, vector<64x64xf32>, vector<8x64xf32> -> vector<8x64xf32>
    %c2_80 = arith.constant 2 : index
    %c0_81 = arith.constant 0 : index
    %c0_82 = arith.constant 0 : index
    %113 = vector.load %arg6[%c2_80, %c0_81, %c0_82] : memref<6x1x64xf32, #tpu.memory_space<vmem>>, vector<1x1x64xf32>
    %114 = vector.shape_cast %113 : vector<1x1x64xf32> to vector<1x64xf32>
    %115 = vector.broadcast %114 : vector<1x64xf32> to vector<8x64xf32>
    %116 = arith.addf %112, %115 : vector<8x64xf32>
    %cst_83 = arith.constant 0.000000e+00 : f32
    %117 = vector.broadcast %cst_83 : f32 to vector<8x64xf32>
    %118 = arith.maximumf %116, %117 : vector<8x64xf32>
    %c2_84 = arith.constant 2 : index
    %c0_85 = arith.constant 0 : index
    %c0_86 = arith.constant 0 : index
    %119 = vector.load %arg7[%c2_84, %c0_85, %c0_86] : memref<6x64x16xf32, #tpu.memory_space<vmem>>, vector<1x64x16xf32>
    %120 = vector.shape_cast %119 : vector<1x64x16xf32> to vector<64x16xf32>
    %cst_87 = arith.constant dense<0.000000e+00> : vector<8x16xf32>
    %121 = tpu.matmul %118, %120, %cst_87 {dimension_numbers = #tpu.dot_dimension_numbers<[1], [0], [0], [1], [0, 0, 1, 1], [], []>} : vector<8x64xf32>, vector<64x16xf32>, vector<8x16xf32> -> vector<8x16xf32>
    %c2_88 = arith.constant 2 : index
    %c0_89 = arith.constant 0 : index
    %c0_90 = arith.constant 0 : index
    %122 = vector.load %arg8[%c2_88, %c0_89, %c0_90] : memref<6x1x16xf32, #tpu.memory_space<vmem>>, vector<1x1x16xf32>
    %123 = vector.shape_cast %122 : vector<1x1x16xf32> to vector<1x16xf32>
    %124 = vector.broadcast %123 : vector<1x16xf32> to vector<8x16xf32>
    %125 = arith.addf %121, %124 : vector<8x16xf32>
    %126 = vector.extract_strided_slice %125 {offsets = [0, 0], sizes = [8, 8], strides = [1, 1]} : vector<8x16xf32> to vector<8x8xf32>
    %127 = math.tanh %126 : vector<8x8xf32>
    %128 = vector.broadcast %98 : f32 to vector<8x8xf32>
    %129 = arith.mulf %127, %128 : vector<8x8xf32>
    %130 = vector.extract_strided_slice %125 {offsets = [0, 8], sizes = [8, 8], strides = [1, 1]} : vector<8x16xf32> to vector<8x8xf32>
    %131 = math.exp %129 : vector<8x8xf32>
    %132 = arith.mulf %90, %131 : vector<8x8xf32>
    %133 = arith.addf %132, %130 : vector<8x8xf32>
    %134 = vector.broadcast %97 : vector<1x8xf32> to vector<8x8xf32>
    %135 = arith.mulf %134, %133 : vector<8x8xf32>
    %136 = arith.addf %100, %135 : vector<8x8xf32>
    %cst_91 = arith.constant dense<0.000000e+00> : vector<8xf32>
    %137 = vector.multi_reduction <add>, %129, %cst_91 [1] : vector<8x8xf32> to vector<8xf32>
    %138 = vector.shape_cast %137 : vector<8xf32> to vector<8x1xf32>
    %139 = arith.addf %93, %138 : vector<8x1xf32>
    %c3 = arith.constant 3 : index
    %c0_92 = arith.constant 0 : index
    %c0_93 = arith.constant 0 : index
    %140 = vector.load %arg1[%c3, %c0_92, %c0_93] : memref<6x1x8xf32, #tpu.memory_space<vmem>>, vector<1x1x8xf32>
    %141 = vector.shape_cast %140 : vector<1x1x8xf32> to vector<1x8xf32>
    %c3_94 = arith.constant 3 : index
    %c0_95 = arith.constant 0 : index
    %c0_96 = arith.constant 0 : index
    %142 = vector.load %arg2[%c3_94, %c0_95, %c0_96] : memref<6x1x8xf32, #tpu.memory_space<vmem>>, vector<1x1x8xf32>
    %143 = vector.shape_cast %142 : vector<1x1x8xf32> to vector<1x8xf32>
    %c3_97 = arith.constant 3 : index
    %144 = memref.load %arg0[%c3_97] : memref<6xf32, #tpu.memory_space<smem>>
    %145 = vector.broadcast %141 : vector<1x8xf32> to vector<8x8xf32>
    %146 = arith.mulf %136, %145 : vector<8x8xf32>
    %c3_98 = arith.constant 3 : index
    %c0_99 = arith.constant 0 : index
    %c0_100 = arith.constant 0 : index
    %147 = vector.load %arg3[%c3_98, %c0_99, %c0_100] : memref<6x8x64xf32, #tpu.memory_space<vmem>>, vector<1x8x64xf32>
    %148 = vector.shape_cast %147 : vector<1x8x64xf32> to vector<8x64xf32>
    %cst_101 = arith.constant dense<0.000000e+00> : vector<8x64xf32>
    %149 = tpu.matmul %146, %148, %cst_101 {dimension_numbers = #tpu.dot_dimension_numbers<[1], [0], [0], [1], [0, 0, 1, 1], [], []>} : vector<8x8xf32>, vector<8x64xf32>, vector<8x64xf32> -> vector<8x64xf32>
    %c3_102 = arith.constant 3 : index
    %c0_103 = arith.constant 0 : index
    %c0_104 = arith.constant 0 : index
    %150 = vector.load %arg4[%c3_102, %c0_103, %c0_104] : memref<6x1x64xf32, #tpu.memory_space<vmem>>, vector<1x1x64xf32>
    %151 = vector.shape_cast %150 : vector<1x1x64xf32> to vector<1x64xf32>
    %152 = vector.broadcast %151 : vector<1x64xf32> to vector<8x64xf32>
    %153 = arith.addf %149, %152 : vector<8x64xf32>
    %cst_105 = arith.constant 0.000000e+00 : f32
    %154 = vector.broadcast %cst_105 : f32 to vector<8x64xf32>
    %155 = arith.maximumf %153, %154 : vector<8x64xf32>
    %c3_106 = arith.constant 3 : index
    %c0_107 = arith.constant 0 : index
    %c0_108 = arith.constant 0 : index
    %156 = vector.load %arg5[%c3_106, %c0_107, %c0_108] : memref<6x64x64xf32, #tpu.memory_space<vmem>>, vector<1x64x64xf32>
    %157 = vector.shape_cast %156 : vector<1x64x64xf32> to vector<64x64xf32>
    %cst_109 = arith.constant dense<0.000000e+00> : vector<8x64xf32>
    %158 = tpu.matmul %155, %157, %cst_109 {dimension_numbers = #tpu.dot_dimension_numbers<[1], [0], [0], [1], [0, 0, 1, 1], [], []>} : vector<8x64xf32>, vector<64x64xf32>, vector<8x64xf32> -> vector<8x64xf32>
    %c3_110 = arith.constant 3 : index
    %c0_111 = arith.constant 0 : index
    %c0_112 = arith.constant 0 : index
    %159 = vector.load %arg6[%c3_110, %c0_111, %c0_112] : memref<6x1x64xf32, #tpu.memory_space<vmem>>, vector<1x1x64xf32>
    %160 = vector.shape_cast %159 : vector<1x1x64xf32> to vector<1x64xf32>
    %161 = vector.broadcast %160 : vector<1x64xf32> to vector<8x64xf32>
    %162 = arith.addf %158, %161 : vector<8x64xf32>
    %cst_113 = arith.constant 0.000000e+00 : f32
    %163 = vector.broadcast %cst_113 : f32 to vector<8x64xf32>
    %164 = arith.maximumf %162, %163 : vector<8x64xf32>
    %c3_114 = arith.constant 3 : index
    %c0_115 = arith.constant 0 : index
    %c0_116 = arith.constant 0 : index
    %165 = vector.load %arg7[%c3_114, %c0_115, %c0_116] : memref<6x64x16xf32, #tpu.memory_space<vmem>>, vector<1x64x16xf32>
    %166 = vector.shape_cast %165 : vector<1x64x16xf32> to vector<64x16xf32>
    %cst_117 = arith.constant dense<0.000000e+00> : vector<8x16xf32>
    %167 = tpu.matmul %164, %166, %cst_117 {dimension_numbers = #tpu.dot_dimension_numbers<[1], [0], [0], [1], [0, 0, 1, 1], [], []>} : vector<8x64xf32>, vector<64x16xf32>, vector<8x16xf32> -> vector<8x16xf32>
    %c3_118 = arith.constant 3 : index
    %c0_119 = arith.constant 0 : index
    %c0_120 = arith.constant 0 : index
    %168 = vector.load %arg8[%c3_118, %c0_119, %c0_120] : memref<6x1x16xf32, #tpu.memory_space<vmem>>, vector<1x1x16xf32>
    %169 = vector.shape_cast %168 : vector<1x1x16xf32> to vector<1x16xf32>
    %170 = vector.broadcast %169 : vector<1x16xf32> to vector<8x16xf32>
    %171 = arith.addf %167, %170 : vector<8x16xf32>
    %172 = vector.extract_strided_slice %171 {offsets = [0, 0], sizes = [8, 8], strides = [1, 1]} : vector<8x16xf32> to vector<8x8xf32>
    %173 = math.tanh %172 : vector<8x8xf32>
    %174 = vector.broadcast %144 : f32 to vector<8x8xf32>
    %175 = arith.mulf %173, %174 : vector<8x8xf32>
    %176 = vector.extract_strided_slice %171 {offsets = [0, 8], sizes = [8, 8], strides = [1, 1]} : vector<8x16xf32> to vector<8x8xf32>
    %177 = math.exp %175 : vector<8x8xf32>
    %178 = arith.mulf %136, %177 : vector<8x8xf32>
    %179 = arith.addf %178, %176 : vector<8x8xf32>
    %180 = vector.broadcast %143 : vector<1x8xf32> to vector<8x8xf32>
    %181 = arith.mulf %180, %179 : vector<8x8xf32>
    %182 = arith.addf %146, %181 : vector<8x8xf32>
    %cst_121 = arith.constant dense<0.000000e+00> : vector<8xf32>
    %183 = vector.multi_reduction <add>, %175, %cst_121 [1] : vector<8x8xf32> to vector<8xf32>
    %184 = vector.shape_cast %183 : vector<8xf32> to vector<8x1xf32>
    %185 = arith.addf %139, %184 : vector<8x1xf32>
    %c4 = arith.constant 4 : index
    %c0_122 = arith.constant 0 : index
    %c0_123 = arith.constant 0 : index
    %186 = vector.load %arg1[%c4, %c0_122, %c0_123] : memref<6x1x8xf32, #tpu.memory_space<vmem>>, vector<1x1x8xf32>
    %187 = vector.shape_cast %186 : vector<1x1x8xf32> to vector<1x8xf32>
    %c4_124 = arith.constant 4 : index
    %c0_125 = arith.constant 0 : index
    %c0_126 = arith.constant 0 : index
    %188 = vector.load %arg2[%c4_124, %c0_125, %c0_126] : memref<6x1x8xf32, #tpu.memory_space<vmem>>, vector<1x1x8xf32>
    %189 = vector.shape_cast %188 : vector<1x1x8xf32> to vector<1x8xf32>
    %c4_127 = arith.constant 4 : index
    %190 = memref.load %arg0[%c4_127] : memref<6xf32, #tpu.memory_space<smem>>
    %191 = vector.broadcast %187 : vector<1x8xf32> to vector<8x8xf32>
    %192 = arith.mulf %182, %191 : vector<8x8xf32>
    %c4_128 = arith.constant 4 : index
    %c0_129 = arith.constant 0 : index
    %c0_130 = arith.constant 0 : index
    %193 = vector.load %arg3[%c4_128, %c0_129, %c0_130] : memref<6x8x64xf32, #tpu.memory_space<vmem>>, vector<1x8x64xf32>
    %194 = vector.shape_cast %193 : vector<1x8x64xf32> to vector<8x64xf32>
    %cst_131 = arith.constant dense<0.000000e+00> : vector<8x64xf32>
    %195 = tpu.matmul %192, %194, %cst_131 {dimension_numbers = #tpu.dot_dimension_numbers<[1], [0], [0], [1], [0, 0, 1, 1], [], []>} : vector<8x8xf32>, vector<8x64xf32>, vector<8x64xf32> -> vector<8x64xf32>
    %c4_132 = arith.constant 4 : index
    %c0_133 = arith.constant 0 : index
    %c0_134 = arith.constant 0 : index
    %196 = vector.load %arg4[%c4_132, %c0_133, %c0_134] : memref<6x1x64xf32, #tpu.memory_space<vmem>>, vector<1x1x64xf32>
    %197 = vector.shape_cast %196 : vector<1x1x64xf32> to vector<1x64xf32>
    %198 = vector.broadcast %197 : vector<1x64xf32> to vector<8x64xf32>
    %199 = arith.addf %195, %198 : vector<8x64xf32>
    %cst_135 = arith.constant 0.000000e+00 : f32
    %200 = vector.broadcast %cst_135 : f32 to vector<8x64xf32>
    %201 = arith.maximumf %199, %200 : vector<8x64xf32>
    %c4_136 = arith.constant 4 : index
    %c0_137 = arith.constant 0 : index
    %c0_138 = arith.constant 0 : index
    %202 = vector.load %arg5[%c4_136, %c0_137, %c0_138] : memref<6x64x64xf32, #tpu.memory_space<vmem>>, vector<1x64x64xf32>
    %203 = vector.shape_cast %202 : vector<1x64x64xf32> to vector<64x64xf32>
    %cst_139 = arith.constant dense<0.000000e+00> : vector<8x64xf32>
    %204 = tpu.matmul %201, %203, %cst_139 {dimension_numbers = #tpu.dot_dimension_numbers<[1], [0], [0], [1], [0, 0, 1, 1], [], []>} : vector<8x64xf32>, vector<64x64xf32>, vector<8x64xf32> -> vector<8x64xf32>
    %c4_140 = arith.constant 4 : index
    %c0_141 = arith.constant 0 : index
    %c0_142 = arith.constant 0 : index
    %205 = vector.load %arg6[%c4_140, %c0_141, %c0_142] : memref<6x1x64xf32, #tpu.memory_space<vmem>>, vector<1x1x64xf32>
    %206 = vector.shape_cast %205 : vector<1x1x64xf32> to vector<1x64xf32>
    %207 = vector.broadcast %206 : vector<1x64xf32> to vector<8x64xf32>
    %208 = arith.addf %204, %207 : vector<8x64xf32>
    %cst_143 = arith.constant 0.000000e+00 : f32
    %209 = vector.broadcast %cst_143 : f32 to vector<8x64xf32>
    %210 = arith.maximumf %208, %209 : vector<8x64xf32>
    %c4_144 = arith.constant 4 : index
    %c0_145 = arith.constant 0 : index
    %c0_146 = arith.constant 0 : index
    %211 = vector.load %arg7[%c4_144, %c0_145, %c0_146] : memref<6x64x16xf32, #tpu.memory_space<vmem>>, vector<1x64x16xf32>
    %212 = vector.shape_cast %211 : vector<1x64x16xf32> to vector<64x16xf32>
    %cst_147 = arith.constant dense<0.000000e+00> : vector<8x16xf32>
    %213 = tpu.matmul %210, %212, %cst_147 {dimension_numbers = #tpu.dot_dimension_numbers<[1], [0], [0], [1], [0, 0, 1, 1], [], []>} : vector<8x64xf32>, vector<64x16xf32>, vector<8x16xf32> -> vector<8x16xf32>
    %c4_148 = arith.constant 4 : index
    %c0_149 = arith.constant 0 : index
    %c0_150 = arith.constant 0 : index
    %214 = vector.load %arg8[%c4_148, %c0_149, %c0_150] : memref<6x1x16xf32, #tpu.memory_space<vmem>>, vector<1x1x16xf32>
    %215 = vector.shape_cast %214 : vector<1x1x16xf32> to vector<1x16xf32>
    %216 = vector.broadcast %215 : vector<1x16xf32> to vector<8x16xf32>
    %217 = arith.addf %213, %216 : vector<8x16xf32>
    %218 = vector.extract_strided_slice %217 {offsets = [0, 0], sizes = [8, 8], strides = [1, 1]} : vector<8x16xf32> to vector<8x8xf32>
    %219 = math.tanh %218 : vector<8x8xf32>
    %220 = vector.broadcast %190 : f32 to vector<8x8xf32>
    %221 = arith.mulf %219, %220 : vector<8x8xf32>
    %222 = vector.extract_strided_slice %217 {offsets = [0, 8], sizes = [8, 8], strides = [1, 1]} : vector<8x16xf32> to vector<8x8xf32>
    %223 = math.exp %221 : vector<8x8xf32>
    %224 = arith.mulf %182, %223 : vector<8x8xf32>
    %225 = arith.addf %224, %222 : vector<8x8xf32>
    %226 = vector.broadcast %189 : vector<1x8xf32> to vector<8x8xf32>
    %227 = arith.mulf %226, %225 : vector<8x8xf32>
    %228 = arith.addf %192, %227 : vector<8x8xf32>
    %cst_151 = arith.constant dense<0.000000e+00> : vector<8xf32>
    %229 = vector.multi_reduction <add>, %221, %cst_151 [1] : vector<8x8xf32> to vector<8xf32>
    %230 = vector.shape_cast %229 : vector<8xf32> to vector<8x1xf32>
    %231 = arith.addf %185, %230 : vector<8x1xf32>
    %c5 = arith.constant 5 : index
    %c0_152 = arith.constant 0 : index
    %c0_153 = arith.constant 0 : index
    %232 = vector.load %arg1[%c5, %c0_152, %c0_153] : memref<6x1x8xf32, #tpu.memory_space<vmem>>, vector<1x1x8xf32>
    %233 = vector.shape_cast %232 : vector<1x1x8xf32> to vector<1x8xf32>
    %c5_154 = arith.constant 5 : index
    %c0_155 = arith.constant 0 : index
    %c0_156 = arith.constant 0 : index
    %234 = vector.load %arg2[%c5_154, %c0_155, %c0_156] : memref<6x1x8xf32, #tpu.memory_space<vmem>>, vector<1x1x8xf32>
    %235 = vector.shape_cast %234 : vector<1x1x8xf32> to vector<1x8xf32>
    %c5_157 = arith.constant 5 : index
    %236 = memref.load %arg0[%c5_157] : memref<6xf32, #tpu.memory_space<smem>>
    %237 = vector.broadcast %233 : vector<1x8xf32> to vector<8x8xf32>
    %238 = arith.mulf %228, %237 : vector<8x8xf32>
    %c5_158 = arith.constant 5 : index
    %c0_159 = arith.constant 0 : index
    %c0_160 = arith.constant 0 : index
    %239 = vector.load %arg3[%c5_158, %c0_159, %c0_160] : memref<6x8x64xf32, #tpu.memory_space<vmem>>, vector<1x8x64xf32>
    %240 = vector.shape_cast %239 : vector<1x8x64xf32> to vector<8x64xf32>
    %cst_161 = arith.constant dense<0.000000e+00> : vector<8x64xf32>
    %241 = tpu.matmul %238, %240, %cst_161 {dimension_numbers = #tpu.dot_dimension_numbers<[1], [0], [0], [1], [0, 0, 1, 1], [], []>} : vector<8x8xf32>, vector<8x64xf32>, vector<8x64xf32> -> vector<8x64xf32>
    %c5_162 = arith.constant 5 : index
    %c0_163 = arith.constant 0 : index
    %c0_164 = arith.constant 0 : index
    %242 = vector.load %arg4[%c5_162, %c0_163, %c0_164] : memref<6x1x64xf32, #tpu.memory_space<vmem>>, vector<1x1x64xf32>
    %243 = vector.shape_cast %242 : vector<1x1x64xf32> to vector<1x64xf32>
    %244 = vector.broadcast %243 : vector<1x64xf32> to vector<8x64xf32>
    %245 = arith.addf %241, %244 : vector<8x64xf32>
    %cst_165 = arith.constant 0.000000e+00 : f32
    %246 = vector.broadcast %cst_165 : f32 to vector<8x64xf32>
    %247 = arith.maximumf %245, %246 : vector<8x64xf32>
    %c5_166 = arith.constant 5 : index
    %c0_167 = arith.constant 0 : index
    %c0_168 = arith.constant 0 : index
    %248 = vector.load %arg5[%c5_166, %c0_167, %c0_168] : memref<6x64x64xf32, #tpu.memory_space<vmem>>, vector<1x64x64xf32>
    %249 = vector.shape_cast %248 : vector<1x64x64xf32> to vector<64x64xf32>
    %cst_169 = arith.constant dense<0.000000e+00> : vector<8x64xf32>
    %250 = tpu.matmul %247, %249, %cst_169 {dimension_numbers = #tpu.dot_dimension_numbers<[1], [0], [0], [1], [0, 0, 1, 1], [], []>} : vector<8x64xf32>, vector<64x64xf32>, vector<8x64xf32> -> vector<8x64xf32>
    %c5_170 = arith.constant 5 : index
    %c0_171 = arith.constant 0 : index
    %c0_172 = arith.constant 0 : index
    %251 = vector.load %arg6[%c5_170, %c0_171, %c0_172] : memref<6x1x64xf32, #tpu.memory_space<vmem>>, vector<1x1x64xf32>
    %252 = vector.shape_cast %251 : vector<1x1x64xf32> to vector<1x64xf32>
    %253 = vector.broadcast %252 : vector<1x64xf32> to vector<8x64xf32>
    %254 = arith.addf %250, %253 : vector<8x64xf32>
    %cst_173 = arith.constant 0.000000e+00 : f32
    %255 = vector.broadcast %cst_173 : f32 to vector<8x64xf32>
    %256 = arith.maximumf %254, %255 : vector<8x64xf32>
    %c5_174 = arith.constant 5 : index
    %c0_175 = arith.constant 0 : index
    %c0_176 = arith.constant 0 : index
    %257 = vector.load %arg7[%c5_174, %c0_175, %c0_176] : memref<6x64x16xf32, #tpu.memory_space<vmem>>, vector<1x64x16xf32>
    %258 = vector.shape_cast %257 : vector<1x64x16xf32> to vector<64x16xf32>
    %cst_177 = arith.constant dense<0.000000e+00> : vector<8x16xf32>
    %259 = tpu.matmul %256, %258, %cst_177 {dimension_numbers = #tpu.dot_dimension_numbers<[1], [0], [0], [1], [0, 0, 1, 1], [], []>} : vector<8x64xf32>, vector<64x16xf32>, vector<8x16xf32> -> vector<8x16xf32>
    %c5_178 = arith.constant 5 : index
    %c0_179 = arith.constant 0 : index
    %c0_180 = arith.constant 0 : index
    %260 = vector.load %arg8[%c5_178, %c0_179, %c0_180] : memref<6x1x16xf32, #tpu.memory_space<vmem>>, vector<1x1x16xf32>
    %261 = vector.shape_cast %260 : vector<1x1x16xf32> to vector<1x16xf32>
    %262 = vector.broadcast %261 : vector<1x16xf32> to vector<8x16xf32>
    %263 = arith.addf %259, %262 : vector<8x16xf32>
    %264 = vector.extract_strided_slice %263 {offsets = [0, 0], sizes = [8, 8], strides = [1, 1]} : vector<8x16xf32> to vector<8x8xf32>
    %265 = math.tanh %264 : vector<8x8xf32>
    %266 = vector.broadcast %236 : f32 to vector<8x8xf32>
    %267 = arith.mulf %265, %266 : vector<8x8xf32>
    %268 = vector.extract_strided_slice %263 {offsets = [0, 8], sizes = [8, 8], strides = [1, 1]} : vector<8x16xf32> to vector<8x8xf32>
    %269 = math.exp %267 : vector<8x8xf32>
    %270 = arith.mulf %228, %269 : vector<8x8xf32>
    %271 = arith.addf %270, %268 : vector<8x8xf32>
    %272 = vector.broadcast %235 : vector<1x8xf32> to vector<8x8xf32>
    %273 = arith.mulf %272, %271 : vector<8x8xf32>
    %274 = arith.addf %238, %273 : vector<8x8xf32>
    %cst_181 = arith.constant dense<0.000000e+00> : vector<8xf32>
    %275 = vector.multi_reduction <add>, %267, %cst_181 [1] : vector<8x8xf32> to vector<8xf32>
    %276 = vector.shape_cast %275 : vector<8xf32> to vector<8x1xf32>
    %277 = arith.addf %231, %276 : vector<8x1xf32>
    %c0_182 = arith.constant 0 : index
    %c0_183 = arith.constant 0 : index
    %278 = vector.load %arg10[%c0_182, %c0_183] : memref<8x8xf32, #tpu.memory_space<vmem>>, vector<8x8xf32>
    tpu.vector_store %arg10[%c0_182, %c0_183], %274 {strides = array<i32>} : memref<8x8xf32, #tpu.memory_space<vmem>>, vector<8x8xf32>,
    %c0_184 = arith.constant 0 : index
    %c0_185 = arith.constant 0 : index
    %279 = vector.load %arg11[%c0_184, %c0_185] : memref<8x1xf32, #tpu.memory_space<vmem>>, vector<8x1xf32>
    tpu.vector_store %arg11[%c0_184, %c0_185], %277 {strides = array<i32>} : memref<8x1xf32, #tpu.memory_space<vmem>>, vector<8x1xf32>,
    return
  }
}

</mosaic_0001>

<bundles_post_ra>
// kernel: tpu_custom_call.1
= control target key start
LH: loop header
LB: loop body
LE: loop exit
PB: predicated region body
PF: predicated region fallthrough
CT: control target
= control target key end

     0   :  { %17 = vsyncpa [#allocation4], 0  ;;  %s3277_s0 = inlined_call_operand.vmem [shape: f32[6], index: 0, kind: input, shape index: {}]   ;;  %s3278_s1 = inlined_call_operand.vmem [shape: f32[6,1,8], index: 1, kind: input, shape index: {}]   ;;  %s3279_s2 = inlined_call_operand.vmem [shape: f32[6,1,8], index: 2, kind: input, shape index: {}]   ;;  %s3280_s3 = inlined_call_operand.vmem [shape: f32[6,8,64], index: 3, kind: input, shape index: {}]   ;;  %s3281_s4 = inlined_call_operand.vmem [shape: f32[6,1,64], index: 4, kind: input, shape index: {}]   ;;  %s3282_s5 = inlined_call_operand.vmem [shape: f32[6,64,64], index: 5, kind: input, shape index: {}]   ;;  %s3283_s6 = inlined_call_operand.vmem [shape: f32[6,1,64], index: 6, kind: input, shape index: {}]   ;;  %s3284_s7 = inlined_call_operand.vmem [shape: f32[6,64,16], index: 7, kind: input, shape index: {}]   ;;  %s3285_s8 = inlined_call_operand.vmem [shape: f32[6,1,16], index: 8, kind: input, shape index: {}]   ;;  %s3286_s9 = inlined_call_operand.vmem [shape: f32[8,8], index: 9, kind: input, shape index: {}]   ;;  %s3287_s10 = inlined_call_operand.hbm [shape: f32[8,8], index: 10, kind: output, shape index: {0}]   ;;  %s3288_s11 = inlined_call_operand.vmem [shape: f32[8,1], index: 11, kind: output, shape index: {1}]  }
   0x1   :  { %18 = vsyncpa [#allocation3], 0  ;;  %s25_s19 = sshll.u32 %s3277_s0, 4  ;;  %s26_s19 = int_to_ptr.vmem [resolvable:$true] %s25_s19 }
   0x2   :  { %s2583_s20 = scalar_lea.vmem %s26_s19, 16  ;;  %p2588_p1 = scmp.lt.s32.totalorder %s26_s19, %s26_s19 }
   0x3   :  { %p2584_p0 = scmp.ne.s32.totalorder %s26_s19, %s2583_s20  ;;  %p2589_p2 = scmp.lt.s32.totalorder %s2583_s20, %s2583_s20 }
   0x5   :  { %p2590_p3 = por %p2589_p2, %p2588_p1 }
   0x7   :  { %p2591_p4 = pnand %p2590_p3, %p2584_p0 }
   0x9   :  { %2594 = shalt.err (!%p2591_p4)
}
   0xa   :  { %s2621_s21 = smov [#allocation2]  }
   0xb   :  { %28 = dma.vmem_to_smem %s26_s19, 16, %s2621_s21, [#allocation4]  }
   0xc   :  { %2617 = dma.done.wait [#allocation4], 16  }
   0xd   :  { %2618 = vsyncadd [#allocation4], 4294967280 }
   0xe   :  { %50 = sfence }
   0xf   :  { %v62_v0 = vld [vmem:[%s3280_s3] sm:$0xff]  ;;  %v2622_v3 = vmov 0.0   ;;  %vm2623_vm0 = vmmov 0   ;;  %vm70_vm1 = vcmask 64512   ;;  %v146_v6 = vld [vmem:[%s3282_s5 + $0x8] sm:$0xff]  ;;  %v147_v7 = vld [vmem:[%s3282_s5 + $0x10] sm:$0xff] }
  0x10   :  { %v2696_v1 = vld [vmem:[%s3286_s9] sm:$0xff]  ;;  %2151 = vmatprep.subr.mxu0 %v2622_v3  ;;  %2153 = vmatprep.mubr.msk.f32.mxu0 %vm2623_vm0, %v2622_v3  ;;  %v2624_v8 = vmov 0.0|0.0   ;;  %v148_v10 = vld [vmem:[%s3282_s5 + $0x18] sm:$0xff]  ;;  %v150_v13 = vld [vmem:[%s3282_s5 + $0x28] sm:$0xff]  ;;  %vm160_vm2 = vcmask 523264   ;;  %s2625_s17 = smov 120  }
  0x11   :  { %v1868_v2 = vld [vmem:[%s3278_s1] ss:$0 sm:$0xff]  ;;  %2152 = vmatpush3.msra.mxu0 %v62_v0  ;;  %2409 = vmatprep.subr.bf16.mxu1 %v2624_v8  ;;  %v2413_v11 = vpack.c.bf16 %v148_v10, %v147_v7  ;;  %v151_v15 = vld [vmem:[%s3282_s5 + $0x30] sm:$0xff]  ;;  %v152_v16 = vld [vmem:[%s3282_s5 + $0x38] sm:$0xff]  ;;  %s54_s18 = sld [smem:[#allocation2]]  ;;  %s1878_s23 = sld [smem:[#allocation2 + $0x1]] }
  0x12   :  { %v2705_v4 = vmul.f32 %v1868_v2, %v2696_v1  ;;  %v145_v5 = vld [vmem:[%s3282_s5] sm:$0xff]  ;;  %2172 = vmatprep.mubr.msk.f32.mxu1 %vm2623_vm0, %v2622_v3  ;;  %2421 = vmatprep.subr.bf16.mxu0 %v2624_v8  ;;  %v2419_v17 = vpack.c.bf16 %v152_v16, %v151_v15  ;;  %v236_v19 = vld [vmem:[%s3284_s7 + $0x8] sm:$0xff]  ;;  %v237_v20 = vld [vmem:[%s3284_s7 + $0x10] sm:$0xff]  ;;  %s1909_s27 = sld [smem:[#allocation2 + $0x2]]  ;;  %s1940_s21 = sld [smem:[#allocation2 + $0x3]] }
  0x13   :  { %v2410_v9 = vpack.c.bf16 %v146_v6, %v145_v5  ;;  %v149_v12 = vld [vmem:[%s3282_s5 + $0x20] sm:$0xff]  ;;  %v238_v22 = vld [vmem:[%s3284_s7 + $0x18] sm:$0xff]  ;;  %v240_v25 = vld [vmem:[%s3284_s7 + $0x28] sm:$0xff]  ;;  %s1971_s0 = sld [smem:[#allocation2 + $0x4]] }
  0x14   :  { %2154 = vmatmul.mubr.msk.f32.vlgmr.msra.gmra.mrb[0].mxu0 %vm70_vm1, %v2705_v4  ;;  %v2416_v14 = vpack.c.bf16 %v150_v13, %v149_v12  ;;  %v235_v18 = vld [vmem:[%s3284_s7] sm:$0xff]  ;;  %v2425_v23 = vpack.c.bf16 %v238_v22, %v237_v20  ;;  %v241_v32 = vld [vmem:[%s3284_s7 + $0x30] sm:$0xff]  ;;  %v242_v33 = vld [vmem:[%s3284_s7 + $0x38] sm:$0xff] }
  0x15   :  { %2411 = vmatpush3.bf16.msra.mxu1 %v2410_v9  ;;  %2191 = vmatprep.mubr.msk.f32.mxu0 %vm2623_vm0, %v2622_v3  ;;  %v2422_v21 = vpack.c.bf16 %v236_v19, %v235_v18  ;;  %v239_v24 = vld [vmem:[%s3284_s7 + $0x20] sm:$0xff]  ;;  %v2431_v34 = vpack.c.bf16 %v242_v33, %v241_v32  ;;  %v1880_v40 = vld [vmem:[%s3280_s3 + $0x8] sm:$0xff]  ;;  %v1886_v44 = vld [vmem:[%s3282_s5 + $0x50] sm:$0xff] }
  0x16   :  { %2412 = vmatprep.subr.bf16.mxu1 %v2624_v8  ;;  %v2428_v26 = vpack.c.bf16 %v240_v25, %v239_v24  ;;  %v1869_v27 = vld [vmem:[%s3281_s4] ss:$0 sm:$0xff]  ;;  %v1885_v43 = vld [vmem:[%s3282_s5 + $0x48] sm:$0xff]  ;;  %v1887_v46 = vld [vmem:[%s3282_s5 + $0x58] sm:$0xff] }
  0x17   :  { %2423 = vmatpush3.bf16.msra.mxu0 %v2422_v21  ;;  %v1871_v35 = vld [vmem:[%s3283_s6] ss:$0 sm:$0xff]  ;;  %v2437_v50 = vpack.c.bf16 %v1887_v46, %v1886_v44  ;;  %v1889_v52 = vld [vmem:[%s3282_s5 + $0x68] sm:$0xff]  ;;  %v324_v55 = vstv %s54_s18  ;;  %v1879_v0 = vld [vmem:[%s3278_s1 + $0x1] ss:$0 sm:$0xff] }
  0x18   :  { %2424 = vmatprep.subr.bf16.mxu0 %v2624_v8  ;;  %v1873_v41 = vld [vmem:[%s3285_s8] ss:$0 sm:$0xff]  ;;  %v1891_v6 = vld [vmem:[%s3282_s5 + $0x78] sm:$0xff]  ;;  %v1896_v9 = vld [vmem:[%s3284_s7 + $0x48] sm:$0xff] }
  0x19   :  { %2414 = vmatpush3.bf16.msra.mxu1 %v2413_v11  ;;  %v1884_v42 = vld [vmem:[%s3282_s5 + $0x40] sm:$0xff]  ;;  %v1897_v10 = vld [vmem:[%s3284_s7 + $0x50] sm:$0xff]  ;;  %v1898_v12 = vld [vmem:[%s3284_s7 + $0x58] sm:$0xff] }
  0x1a   :  { %2415 = vmatprep.subr.bf16.mxu1 %v2624_v8  ;;  %v2434_v45 = vpack.c.bf16 %v1885_v43, %v1884_v42  ;;  %v1888_v51 = vld [vmem:[%s3282_s5 + $0x60] sm:$0xff]  ;;  %v2449_v13 = vpack.c.bf16 %v1898_v12, %v1897_v10  ;;  %v1900_v15 = vld [vmem:[%s3284_s7 + $0x68] sm:$0xff]  ;;  %v1901_v22 = vld [vmem:[%s3284_s7 + $0x70] sm:$0xff] }
  0x1b   :  { %2426 = vmatpush3.bf16.msra.mxu0 %v2425_v23  ;;  %v2440_v53 = vpack.c.bf16 %v1889_v52, %v1888_v51  ;;  %v1875_v60 = vld [vmem:[%s3279_s2] ss:$0 sm:$0xff]  ;;  %v1902_v23 = vld [vmem:[%s3284_s7 + $0x78] sm:$0xff]  ;;  %v1893_v25 = vld [vmem:[%s3283_s6 + $0x1] ss:$0 sm:$0xff] }
  0x1c   :  { %2427 = vmatprep.subr.bf16.mxu0 %v2624_v8  ;;  %v2455_v24 = vpack.c.bf16 %v1902_v23, %v1901_v22  ;;  %v1915_v32 = vld [vmem:[%s3282_s5 + $0x80] sm:$0xff]  ;;  %v1916_v33 = vld [vmem:[%s3282_s5 + $0x88] sm:$0xff] }
  0x1d   :  { %2417 = vmatpush3.bf16.msra.mxu1 %v2416_v14  ;;  %v1899_v14 = vld [vmem:[%s3284_s7 + $0x60] sm:$0xff]  ;;  %v1920_v42 = vld [vmem:[%s3282_s5 + $0xa8] sm:$0xff] }
  0x1e   :  { %2418 = vmatprep.subr.bf16.mxu1 %v2624_v8  ;;  %v2452_v16 = vpack.c.bf16 %v1900_v15, %v1899_v14  ;;  %v1933_v14 = vld [vmem:[%s3284_s7 + $0xb8] sm:$0xff]  ;;  %v1935_v22 = vld [vmem:[%s3285_s8 + $0x2] ss:$0 sm:$0xff] }
  0x1f   :  { %2429 = vmatpush3.bf16.msra.mxu0 %v2428_v26  ;;  %v1946_v23 = vld [vmem:[%s3282_s5 + $0xc0] sm:$0xff] }
  0x20   :  { %2430 = vmatprep.subr.bf16.mxu0 %v2624_v8 }
  0x21   :  { %2420 = vmatpush3.bf16.msra.mxu1 %v2419_v17  ;;  %v1882_v17 = vld [vmem:[%s3281_s4 + $0x1] ss:$0 sm:$0xff] }
  0x22   :  { %2194 = vmatprep.subr.mxu1 %v2622_v3 }
  0x23   :  { %2432 = vmatpush3.bf16.msra.mxu0 %v2431_v34  ;;  %v1917_v34 = vld [vmem:[%s3282_s5 + $0x90] sm:$0xff] }
  0x24   :  { %2433 = vmatprep.subr.bf16.mxu0 %v2624_v8 }
  0xe7   :  { %v140_v28 = vpop.f32.mrb[0].mxu0 }
  0xe8   :  { %v141_v29 = vadd.f32 %v1869_v27, %v140_v28  ;;  %v2155_v30 = vpop.f32.mrb[1].mxu0 }
  0xe9   :  { %v1911_v30 = vld [vmem:[%s3280_s3 + $0x10] sm:$0xff] }
  0xea   :  { %v144_v31 = vmax.f32 %v141_v29, 0.0 }
  0xec   :  { %2173 = vmatmul.mubr.msk.f32.vlgmr.msra.gmra.mrb[0].mxu1 %vm160_vm2, %v144_v31  ;;  %v1904_v31 = vld [vmem:[%s3285_s8 + $0x1] ss:$0 sm:$0xff] }
  0xed   :  { %2196 = vmatprep.mubr.msk.f32.mxu1 %vm2623_vm0, %v2622_v3  ;;  %2195 = vmatpush3.msra.mxu1 %v1880_v40 }
  0xee   :  { %2445 = vmatprep.subr.bf16.mxu1 %v2624_v8 }
 0x1bf   :  { %v230_v36 = vpop.f32.mrb[0].mxu1 }
 0x1c0   :  { %v231_v37 = vadd.f32 %v1871_v35, %v230_v36  ;;  %v2174_v38 = vpop.f32.mrb[1].mxu1  ;;  %v2458_v35 = vpack.c.bf16 %v1916_v33, %v1915_v32  ;;  %v1918_v36 = vld [vmem:[%s3282_s5 + $0x98] sm:$0xff]  ;;  %v1950_v32 = vld [vmem:[%s3282_s5 + $0xe0] sm:$0xff]  ;;  %v1951_v33 = vld [vmem:[%s3282_s5 + $0xe8] sm:$0xff] }
 0x1c1   :  { %v2461_v40 = vpack.c.bf16 %v1918_v36, %v1917_v34  ;;  %v2488_v34 = vpack.c.bf16 %v1951_v33, %v1950_v32  ;;  %v924_v36 = vstv %s1909_s27 }
 0x1c2   :  { %v234_v39 = vmax.f32 %v231_v37, 0.0 }
 0x1c4   :  { %2192 = vmatmul.mubr.msk.f32.vlgmr.msra.gmra.mrb[2].mxu0 %vm160_vm2, %v234_v39 }
 0x1c5   :  { %2215 = vmatprep.mubr.msk.f32.mxu0 %vm2623_vm0, %v2622_v3  ;;  %2435 = vmatpush3.bf16.msra.mxu0 %v2434_v45  ;;  %v624_v45 = vstv %s1878_s23 }
 0x1c6   :  { %2436 = vmatprep.subr.bf16.mxu0 %v2624_v8 }
 0x1c9   :  { %2438 = vmatpush3.bf16.msra.mxu0 %v2437_v50  ;;  %v1906_v50 = vld [vmem:[%s3279_s2 + $0x1] ss:$0 sm:$0xff] }
 0x1ca   :  { %2439 = vmatprep.subr.bf16.mxu0 %v2624_v8 }
 0x1cd   :  { %2441 = vmatpush3.bf16.msra.mxu0 %v2440_v53 }
 0x1ce   :  { %2442 = vmatprep.subr.bf16.mxu0 %v2624_v8 }
 0x297   :  { %v319_v47 = vpop.f32.mrb[2].mxu0 }
 0x298   :  { %v320_v48 = vadd.f32 %v1873_v41, %v319_v47  ;;  %v2193_v49 = vpop.f32.mrb[3].mxu0  ;;  %v1919_v41 = vld [vmem:[%s3282_s5 + $0xa0] sm:$0xff] }
 0x299   :  { %v2464_v43 = vpack.c.bf16 %v1920_v42, %v1919_v41  ;;  %v1937_v41 = vld [vmem:[%s3279_s2 + $0x2] ss:$0 sm:$0xff] }
 0x29a   :  { %330 = vrot.lane.b32.xlu0 %v320_v48, %s2625_s17  ;;  %2559 = vtanh.f32 %v320_v48 }
 0x2a4   :  { %v2560_v54 = vpop.eup %2559 }
 0x2a5   :  { %v2812_v56 = vmul.f32 %v2560_v54, %v324_v55  ;;  %v1910_v54 = vld [vmem:[%s3278_s1 + $0x2] ss:$0 sm:$0xff] }
 0x2a7   :  { %v326_v57 = vmul.f32 1.442695, %v2812_v56 }
 0x2a9   :  { %2561 = vpow2.f32 %v326_v57 }
 0x2b3   :  { %v2562_v58 = vpop.eup %2561 }
 0x2b4   :  { %v328_v59 = vmul.f32 %v2562_v58, %v2696_v1  ;;  %v1890_v1 = vld [vmem:[%s3282_s5 + $0x70] sm:$0xff] }
 0x2b5   :  { %v2443_v7 = vpack.c.bf16 %v1891_v6, %v1890_v1  ;;  %v1921_v58 = vld [vmem:[%s3282_s5 + $0xb0] sm:$0xff]  ;;  %v1930_v1 = vld [vmem:[%s3284_s7 + $0xa0] sm:$0xff]  ;;  %v1931_v6 = vld [vmem:[%s3284_s7 + $0xa8] sm:$0xff] }
 0x2b7   :  { %2444 = vmatpush3.bf16.msra.mxu0 %v2443_v7  ;;  %v2476_v7 = vpack.c.bf16 %v1931_v6, %v1930_v1  ;;  %v1963_v1 = vld [vmem:[%s3284_s7 + $0xf0] sm:$0xff]  ;;  %v1964_v6 = vld [vmem:[%s3284_s7 + $0xf8] sm:$0xff] }
 0x2b8   :  { %2237 = vmatprep.subr.mxu0 %v2622_v3 }
 0x30c   :  { %v331_v61 = vpop.permute.xlu0 %330 }
 0x30d   :  { %v333_v62 = vadd.f32 %v331_v61, %v328_v59  ;;  %v1922_v59 = vld [vmem:[%s3282_s5 + $0xb8] sm:$0xff]  ;;  %v1926_v61 = vld [vmem:[%s3284_s7 + $0x80] sm:$0xff] }
 0x30f   :  { %v340_v63 = vmul.f32 %v1875_v60, %v333_v62  ;;  %v2467_v60 = vpack.c.bf16 %v1922_v59, %v1921_v58  ;;  %v1927_v62 = vld [vmem:[%s3284_s7 + $0x88] sm:$0xff]  ;;  %v1961_v59 = vld [vmem:[%s3284_s7 + $0xe0] sm:$0xff] }
 0x311   :  { %v2823_v2 = vadd.f32 %v340_v63, %v2705_v4  ;;  %v1895_v4 = vld [vmem:[%s3284_s7 + $0x40] sm:$0xff]  ;;  %v1928_v63 = vld [vmem:[%s3284_s7 + $0x90] sm:$0xff] }
 0x312   :  { %v2446_v11 = vpack.c.bf16 %v1896_v9, %v1895_v4  ;;  %v1913_v4 = vld [vmem:[%s3281_s4 + $0x2] ss:$0 sm:$0xff] }
 0x313   :  { %v2826_v5 = vmul.f32 %v1879_v0, %v2823_v2  ;;  %v2470_v0 = vpack.c.bf16 %v1927_v62, %v1926_v61  ;;  %v1944_v62 = vld [vmem:[%s3281_s4 + $0x3] ss:$0 sm:$0xff] }
 0x315   :  { %2197 = vmatmul.mubr.msk.f32.vlgmr.msra.gmra.mrb[2].mxu1 %vm70_vm1, %v2826_v5 }
 0x316   :  { %2234 = vmatprep.mubr.msk.f32.mxu1 %vm2623_vm0, %v2622_v3  ;;  %2447 = vmatpush3.bf16.msra.mxu1 %v2446_v11 }
 0x317   :  { %2448 = vmatprep.subr.bf16.mxu1 %v2624_v8 }
 0x31a   :  { %2450 = vmatpush3.bf16.msra.mxu1 %v2449_v13  ;;  %v1932_v13 = vld [vmem:[%s3284_s7 + $0xb0] sm:$0xff] }
 0x31b   :  { %2451 = vmatprep.subr.bf16.mxu1 %v2624_v8  ;;  %v2479_v15 = vpack.c.bf16 %v1933_v14, %v1932_v13  ;;  %v1973_v13 = vld [vmem:[%s3280_s3 + $0x20] sm:$0xff] }
 0x31c   :  { %v1966_v14 = vld [vmem:[%s3285_s8 + $0x3] ss:$0 sm:$0xff] }
 0x31e   :  { %2453 = vmatpush3.bf16.msra.mxu1 %v2452_v16  ;;  %v1924_v16 = vld [vmem:[%s3283_s6 + $0x2] ss:$0 sm:$0xff] }
 0x31f   :  { %2454 = vmatprep.subr.bf16.mxu1 %v2624_v8 }
 0x322   :  { %2456 = vmatpush3.bf16.msra.mxu1 %v2455_v24  ;;  %v1947_v24 = vld [vmem:[%s3282_s5 + $0xc8] sm:$0xff] }
 0x323   :  { %2457 = vmatprep.subr.bf16.mxu1 %v2624_v8 }
 0x3e8   :  { %v437_v18 = vpop.f32.mrb[2].mxu1 }
 0x3e9   :  { %v438_v19 = vadd.f32 %v1882_v17, %v437_v18  ;;  %v2198_v20 = vpop.f32.mrb[3].mxu1 }
 0x3eb   :  { %v441_v21 = vmax.f32 %v438_v19, 0.0 }
 0x3ed   :  { %2216 = vmatmul.mubr.msk.f32.vlgmr.msra.gmra.mrb[4].mxu0 %vm160_vm2, %v441_v21  ;;  %v1942_v21 = vld [vmem:[%s3280_s3 + $0x18] sm:$0xff] }
 0x3ee   :  { %2239 = vmatprep.mubr.msk.f32.mxu0 %vm2623_vm0, %v2622_v3  ;;  %2238 = vmatpush3.msra.mxu0 %v1911_v30 }
 0x3ef   :  { %2469 = vmatprep.subr.bf16.mxu0 %v2624_v8 }
 0x4c0   :  { %v528_v26 = vpop.f32.mrb[4].mxu0 }
 0x4c1   :  { %v529_v27 = vadd.f32 %v1893_v25, %v528_v26  ;;  %v2217_v28 = vpop.f32.mrb[5].mxu0  ;;  %v1948_v25 = vld [vmem:[%s3282_s5 + $0xd0] sm:$0xff]  ;;  %v2482_v26 = vpack.c.bf16 %v1947_v24, %v1946_v23  ;;  %v1977_v23 = vld [vmem:[%s3282_s5 + $0x100] sm:$0xff]  ;;  %v1978_v24 = vld [vmem:[%s3282_s5 + $0x108] sm:$0xff] }
 0x4c3   :  { %v532_v29 = vmax.f32 %v529_v27, 0.0  ;;  %v1949_v27 = vld [vmem:[%s3282_s5 + $0xd8] sm:$0xff] }
 0x4c5   :  { %2235 = vmatmul.mubr.msk.f32.vlgmr.msra.gmra.mrb[4].mxu1 %vm160_vm2, %v532_v29 }
 0x4c6   :  { %2258 = vmatprep.mubr.msk.f32.mxu1 %vm2623_vm0, %v2622_v3  ;;  %2459 = vmatpush3.bf16.msra.mxu1 %v2458_v35 }
 0x4c7   :  { %2460 = vmatprep.subr.bf16.mxu1 %v2624_v8 }
 0x4ca   :  { %2462 = vmatpush3.bf16.msra.mxu1 %v2461_v40 }
 0x4cb   :  { %2463 = vmatprep.subr.bf16.mxu1 %v2624_v8 }
 0x4ce   :  { %2465 = vmatpush3.bf16.msra.mxu1 %v2464_v43 }
 0x4cf   :  { %2466 = vmatprep.subr.bf16.mxu1 %v2624_v8 }
 0x4d2   :  { %2468 = vmatpush3.bf16.msra.mxu1 %v2467_v60  ;;  %v1962_v60 = vld [vmem:[%s3284_s7 + $0xe8] sm:$0xff] }
 0x4d3   :  { %2280 = vmatprep.subr.mxu1 %v2622_v3  ;;  %v2500_v61 = vpack.c.bf16 %v1962_v60, %v1961_v59 }
 0x598   :  { %v619_v37 = vpop.f32.mrb[4].mxu1 }
 0x599   :  { %v620_v38 = vadd.f32 %v1904_v31, %v619_v37  ;;  %v2236_v39 = vpop.f32.mrb[5].mxu1  ;;  %v2485_v31 = vpack.c.bf16 %v1949_v27, %v1948_v25  ;;  %v1979_v25 = vld [vmem:[%s3282_s5 + $0x110] sm:$0xff] }
 0x59b   :  { %630 = vrot.lane.b32.xlu0 %v620_v38, %s2625_s17  ;;  %2563 = vtanh.f32 %v620_v38 }
 0x5a5   :  { %v2564_v44 = vpop.eup %2563 }
 0x5a6   :  { %v2908_v46 = vmul.f32 %v2564_v44, %v624_v45  ;;  %v1941_v45 = vld [vmem:[%s3278_s1 + $0x3] ss:$0 sm:$0xff] }
 0x5a8   :  { %v626_v47 = vmul.f32 1.442695, %v2908_v46 }
 0x5aa   :  { %2565 = vpow2.f32 %v626_v47 }
 0x5b4   :  { %v2566_v48 = vpop.eup %2565 }
 0x5b5   :  { %v628_v49 = vmul.f32 %v2566_v48, %v2823_v2  ;;  %v1929_v2 = vld [vmem:[%s3284_s7 + $0x98] sm:$0xff] }
 0x60d   :  { %v631_v51 = vpop.permute.xlu0 %630 }
 0x60e   :  { %v633_v52 = vadd.f32 %v631_v51, %v628_v49  ;;  %v1952_v49 = vld [vmem:[%s3282_s5 + $0xf0] sm:$0xff] }
 0x610   :  { %v640_v53 = vmul.f32 %v1906_v50, %v633_v52  ;;  %v1953_v50 = vld [vmem:[%s3282_s5 + $0xf8] sm:$0xff]  ;;  %v1957_v52 = vld [vmem:[%s3284_s7 + $0xc0] sm:$0xff] }
 0x611   :  { %v2491_v51 = vpack.c.bf16 %v1953_v50, %v1952_v49  ;;  %v1991_v50 = vld [vmem:[%s3284_s7 + $0x118] sm:$0xff] }
 0x612   :  { %v2919_v55 = vadd.f32 %v640_v53, %v2826_v5  ;;  %v2473_v5 = vpack.c.bf16 %v1929_v2, %v1928_v63  ;;  %v1958_v53 = vld [vmem:[%s3284_s7 + $0xc8] sm:$0xff] }
 0x614   :  { %v2922_v57 = vmul.f32 %v1910_v54, %v2919_v55  ;;  %v1959_v54 = vld [vmem:[%s3284_s7 + $0xd0] sm:$0xff] }
 0x616   :  { %2240 = vmatmul.mubr.msk.f32.vlgmr.msra.gmra.mrb[6].mxu0 %vm70_vm1, %v2922_v57 }
 0x617   :  { %2277 = vmatprep.mubr.msk.f32.mxu0 %vm2623_vm0, %v2622_v3  ;;  %2471 = vmatpush3.bf16.msra.mxu0 %v2470_v0 }
 0x618   :  { %2472 = vmatprep.subr.bf16.mxu0 %v2624_v8 }
 0x61b   :  { %2474 = vmatpush3.bf16.msra.mxu0 %v2473_v5 }
 0x61c   :  { %2475 = vmatprep.subr.bf16.mxu0 %v2624_v8 }
 0x61f   :  { %2477 = vmatpush3.bf16.msra.mxu0 %v2476_v7  ;;  %v2503_v7 = vpack.c.bf16 %v1964_v6, %v1963_v1 }
 0x620   :  { %2478 = vmatprep.subr.bf16.mxu0 %v2624_v8 }
 0x623   :  { %2480 = vmatpush3.bf16.msra.mxu0 %v2479_v15 }
 0x624   :  { %2481 = vmatprep.subr.bf16.mxu0 %v2624_v8 }
 0x6e9   :  { %v737_v9 = vpop.f32.mrb[6].mxu0 }
 0x6ea   :  { %v738_v10 = vadd.f32 %v1913_v4, %v737_v9  ;;  %v2241_v11 = vpop.f32.mrb[7].mxu0  ;;  %v1955_v4 = vld [vmem:[%s3283_s6 + $0x3] ss:$0 sm:$0xff] }
 0x6ec   :  { %v741_v12 = vmax.f32 %v738_v10, 0.0 }
 0x6ee   :  { %2259 = vmatmul.mubr.msk.f32.vlgmr.msra.gmra.mrb[6].mxu1 %vm160_vm2, %v741_v12 }
 0x6ef   :  { %2282 = vmatprep.mubr.msk.f32.mxu1 %vm2623_vm0, %v2622_v3  ;;  %2281 = vmatpush3.msra.mxu1 %v1942_v21 }
 0x6f0   :  { %2493 = vmatprep.subr.bf16.mxu1 %v2624_v8 }
 0x7c1   :  { %v828_v17 = vpop.f32.mrb[6].mxu1 }
 0x7c2   :  { %v829_v18 = vadd.f32 %v1924_v16, %v828_v17  ;;  %v2260_v19 = vpop.f32.mrb[7].mxu1 }
 0x7c3   :  { %v1224_v19 = vstv %s1940_s21 }
 0x7c4   :  { %v832_v20 = vmax.f32 %v829_v18, 0.0 }
 0x7c6   :  { %2278 = vmatmul.mubr.msk.f32.vlgmr.msra.gmra.mrb[8].mxu0 %vm160_vm2, %v832_v20  ;;  %v342_v20 = vsel %vm70_vm1, %v2812_v56, 0.0  ;;  %v1980_v56 = vld [vmem:[%s3282_s5 + $0x118] sm:$0xff] }
 0x7c7   :  { %2301 = vmatprep.mubr.msk.f32.mxu0 %vm2623_vm0, %v2622_v3  ;;  %2483 = vmatpush3.bf16.msra.mxu0 %v2482_v26  ;;  %v2506_v26 = vpack.c.bf16 %v1978_v24, %v1977_v23  ;;  %v2509_v27 = vpack.c.bf16 %v1980_v56, %v1979_v25  ;;  %v2013_v23 = vld [vmem:[%s3282_s5 + $0x168] sm:$0xff] }
 0x7c8   :  { %2484 = vmatprep.subr.bf16.mxu0 %v2624_v8 }
 0x7cb   :  { %2486 = vmatpush3.bf16.msra.mxu0 %v2485_v31 }
 0x7cc   :  { %2487 = vmatprep.subr.bf16.mxu0 %v2624_v8 }
 0x7cf   :  { %2489 = vmatpush3.bf16.msra.mxu0 %v2488_v34  ;;  %v1968_v34 = vld [vmem:[%s3279_s2 + $0x3] ss:$0 sm:$0xff] }
 0x7d0   :  { %2490 = vmatprep.subr.bf16.mxu0 %v2624_v8 }
 0x7d3   :  { %2492 = vmatpush3.bf16.msra.mxu0 %v2491_v51 }
 0x7d4   :  { %2323 = vmatprep.subr.mxu0 %v2622_v3 }
 0x899   :  { %v919_v28 = vpop.f32.mrb[8].mxu0 }
 0x89a   :  { %v920_v29 = vadd.f32 %v1935_v22, %v919_v28  ;;  %v2279_v30 = vpop.f32.mrb[9].mxu0  ;;  %v1981_v28 = vld [vmem:[%s3282_s5 + $0x120] sm:$0xff] }
 0x89c   :  { %930 = vrot.lane.b32.xlu1 %v920_v29, %s2625_s17  ;;  %2567 = vtanh.f32 %v920_v29  ;;  %v1982_v29 = vld [vmem:[%s3282_s5 + $0x128] sm:$0xff] }
 0x89d   :  { %v2512_v30 = vpack.c.bf16 %v1982_v29, %v1981_v28 }
 0x8a6   :  { %v2568_v35 = vpop.eup %2567 }
 0x8a7   :  { %v3004_v37 = vmul.f32 %v2568_v35, %v924_v36 }
 0x8a9   :  { %v926_v38 = vmul.f32 1.442695, %v3004_v37 }
 0x8ab   :  { %2569 = vpow2.f32 %v926_v38 }
 0x8b5   :  { %v2570_v39 = vpop.eup %2569 }
 0x8b6   :  { %v928_v40 = vmul.f32 %v2570_v39, %v2919_v55  ;;  %v2494_v55 = vpack.c.bf16 %v1958_v53, %v1957_v52  ;;  %v1972_v39 = vld [vmem:[%s3278_s1 + $0x4] ss:$0 sm:$0xff]  ;;  %v1993_v53 = vld [vmem:[%s3284_s7 + $0x128] sm:$0xff] }
 0x8b7   :  { %v1992_v52 = vld [vmem:[%s3284_s7 + $0x120] sm:$0xff] }
 0x90e   :  { %v931_v42 = vpop.permute.xlu1 %930 }
 0x90f   :  { %v933_v43 = vadd.f32 %v931_v42, %v928_v40  ;;  %v1983_v42 = vld [vmem:[%s3282_s5 + $0x130] sm:$0xff] }
 0x911   :  { %v940_v44 = vmul.f32 %v1937_v41, %v933_v43  ;;  %v1984_v43 = vld [vmem:[%s3282_s5 + $0x138] sm:$0xff] }
 0x913   :  { %v3015_v47 = vadd.f32 %v940_v44, %v2922_v57  ;;  %v1960_v57 = vld [vmem:[%s3284_s7 + $0xd8] sm:$0xff]  ;;  %v2515_v44 = vpack.c.bf16 %v1984_v43, %v1983_v42  ;;  %v2023_v43 = vld [vmem:[%s3284_s7 + $0x160] sm:$0xff] }
 0x914   :  { %v2497_v58 = vpack.c.bf16 %v1960_v57, %v1959_v54  ;;  %v2524_v54 = vpack.c.bf16 %v1993_v53, %v1992_v52  ;;  %v2025_v52 = vld [vmem:[%s3284_s7 + $0x170] sm:$0xff]  ;;  %v2026_v53 = vld [vmem:[%s3284_s7 + $0x178] sm:$0xff] }
 0x915   :  { %v3018_v48 = vmul.f32 %v1941_v45, %v3015_v47  ;;  %v1988_v45 = vld [vmem:[%s3284_s7 + $0x100] sm:$0xff] }
 0x917   :  { %2283 = vmatmul.mubr.msk.f32.vlgmr.msra.gmra.mrb[8].mxu1 %vm70_vm1, %v3018_v48 }
 0x918   :  { %2320 = vmatprep.mubr.msk.f32.mxu1 %vm2623_vm0, %v2622_v3  ;;  %2495 = vmatpush3.bf16.msra.mxu1 %v2494_v55  ;;  %v1975_v55 = vld [vmem:[%s3281_s4 + $0x4] ss:$0 sm:$0xff] }
 0x919   :  { %2496 = vmatprep.subr.bf16.mxu1 %v2624_v8 }
 0x91c   :  { %2498 = vmatpush3.bf16.msra.mxu1 %v2497_v58 }
 0x91d   :  { %2499 = vmatprep.subr.bf16.mxu1 %v2624_v8 }
 0x920   :  { %2501 = vmatpush3.bf16.msra.mxu1 %v2500_v61  ;;  %v1994_v61 = vld [vmem:[%s3284_s7 + $0x130] sm:$0xff] }
 0x921   :  { %2502 = vmatprep.subr.bf16.mxu1 %v2624_v8 }
 0x924   :  { %2504 = vmatpush3.bf16.msra.mxu1 %v2503_v7  ;;  %v2004_v7 = vld [vmem:[%s3280_s3 + $0x28] sm:$0xff] }
 0x925   :  { %2505 = vmatprep.subr.bf16.mxu1 %v2624_v8 }
 0x9ea   :  { %v1037_v63 = vpop.f32.mrb[8].mxu1 }
 0x9eb   :  { %v1038_v0 = vadd.f32 %v1944_v62, %v1037_v63  ;;  %v2284_v2 = vpop.f32.mrb[9].mxu1  ;;  %v1995_v62 = vld [vmem:[%s3284_s7 + $0x138] sm:$0xff] }
 0x9ec   :  { %v2527_v63 = vpack.c.bf16 %v1995_v62, %v1994_v61 }
 0x9ed   :  { %v1041_v5 = vmax.f32 %v1038_v0, 0.0  ;;  %v1986_v0 = vld [vmem:[%s3283_s6 + $0x4] ss:$0 sm:$0xff] }
 0x9ef   :  { %2302 = vmatmul.mubr.msk.f32.vlgmr.msra.gmra.mrb[10].mxu0 %vm160_vm2, %v1041_v5 }
 0x9f0   :  { %2325 = vmatprep.mubr.msk.f32.mxu0 %vm2623_vm0, %v2622_v3  ;;  %2324 = vmatpush3.msra.mxu0 %v1973_v13 }
 0x9f1   :  { %2517 = vmatprep.subr.bf16.mxu0 %v2624_v8 }
 0xac2   :  { %v1128_v9 = vpop.f32.mrb[10].mxu0 }
 0xac3   :  { %v1129_v10 = vadd.f32 %v1955_v4, %v1128_v9  ;;  %v2303_v11 = vpop.f32.mrb[11].mxu0  ;;  %v1997_v4 = vld [vmem:[%s3285_s8 + $0x4] ss:$0 sm:$0xff] }
 0xac5   :  { %v1132_v12 = vmax.f32 %v1129_v10, 0.0 }
 0xac7   :  { %2321 = vmatmul.mubr.msk.f32.vlgmr.msra.gmra.mrb[10].mxu1 %vm160_vm2, %v1132_v12  ;;  %v642_v12 = vsel %vm70_vm1, %v2908_v46, 0.0  ;;  %v2010_v46 = vld [vmem:[%s3282_s5 + $0x150] sm:$0xff] }
 0xac8   :  { %2344 = vmatprep.mubr.msk.f32.mxu1 %vm2623_vm0, %v2622_v3  ;;  %2507 = vmatpush3.bf16.msra.mxu1 %v2506_v26 }
 0xac9   :  { %2508 = vmatprep.subr.bf16.mxu1 %v2624_v8 }
 0xacc   :  { %2510 = vmatpush3.bf16.msra.mxu1 %v2509_v27  ;;  %v1999_v27 = vld [vmem:[%s3279_s2 + $0x4] ss:$0 sm:$0xff] }
 0xacd   :  { %2511 = vmatprep.subr.bf16.mxu1 %v2624_v8 }
 0xad0   :  { %2513 = vmatpush3.bf16.msra.mxu1 %v2512_v30 }
 0xad1   :  { %2514 = vmatprep.subr.bf16.mxu1 %v2624_v8 }
 0xad4   :  { %2516 = vmatpush3.bf16.msra.mxu1 %v2515_v44  ;;  %v2024_v44 = vld [vmem:[%s3284_s7 + $0x168] sm:$0xff] }
 0xad5   :  { %2366 = vmatprep.subr.mxu1 %v2622_v3 }
 0xb9a   :  { %v1219_v15 = vpop.f32.mrb[10].mxu1 }
 0xb9b   :  { %v1220_v16 = vadd.f32 %v1966_v14, %v1219_v15  ;;  %v2322_v17 = vpop.f32.mrb[11].mxu1  ;;  %v1524_v14 = vstv %s1971_s0  ;;  %v942_v15 = vsel %vm70_vm1, %v3004_v37, 0.0  ;;  %v2011_v37 = vld [vmem:[%s3282_s5 + $0x158] sm:$0xff] }
 0xb9d   :  { %1230 = vrot.lane.b32.xlu1 %v1220_v16, %s2625_s17  ;;  %2571 = vtanh.f32 %v1220_v16 }
 0xba7   :  { %v2572_v18 = vpop.eup %2571 }
 0xba8   :  { %v1225_v21 = vmul.f32 %v2572_v18, %v1224_v19  ;;  %v2008_v18 = vld [vmem:[%s3282_s5 + $0x140] sm:$0xff]  ;;  %v2009_v19 = vld [vmem:[%s3282_s5 + $0x148] sm:$0xff] }
 0xbaa   :  { %v1242_v22 = vsel %vm70_vm1, %v1225_v21, 0.0  ;;  %v1226_v31 = vmul.f32 1.442695, %v1225_v21  ;;  %v2533_v21 = vpack.c.bf16 %v2011_v37, %v2010_v46 }
 0xbac   :  { %2573 = vpow2.f32 %v1226_v31  ;;  %v2003_v31 = vld [vmem:[%s3278_s1 + $0x5] ss:$0 sm:$0xff] }
 0xbb6   :  { %v2574_v32 = vpop.eup %2573 }
 0xbb7   :  { %v1228_v33 = vmul.f32 %v2574_v32, %v3015_v47  ;;  %v1989_v47 = vld [vmem:[%s3284_s7 + $0x108] sm:$0xff] }
 0xbb8   :  { %v2518_v49 = vpack.c.bf16 %v1989_v47, %v1988_v45  ;;  %v2548_v45 = vpack.c.bf16 %v2024_v44, %v2023_v43  ;;  %v2006_v47 = vld [vmem:[%s3281_s4 + $0x5] ss:$0 sm:$0xff] }
 0xbc1   :  { %343 = vadd.xlane.f32.xlu1 %v342_v20  ;;  %v2530_v20 = vpack.c.bf16 %v2009_v19, %v2008_v18 }
 0xbc5   :  { %1243 = vadd.xlane.f32.xlu1 %v1242_v22  ;;  %v2012_v22 = vld [vmem:[%s3282_s5 + $0x160] sm:$0xff] }
 0xbc6   :  { %v2536_v24 = vpack.c.bf16 %v2013_v23, %v2012_v22 }
 0xc0f   :  { %v1231_v35 = vpop.permute.xlu1 %1230 }
 0xc10   :  { %v1233_v36 = vadd.f32 %v1231_v35, %v1228_v33  ;;  %v2015_v35 = vld [vmem:[%s3282_s5 + $0x178] sm:$0xff] }
 0xc12   :  { %v1240_v38 = vmul.f32 %v1968_v34, %v1233_v36  ;;  %v2014_v34 = vld [vmem:[%s3282_s5 + $0x170] sm:$0xff] }
 0xc13   :  { %v2539_v36 = vpack.c.bf16 %v2015_v35, %v2014_v34 }
 0xc14   :  { %v3111_v40 = vadd.f32 %v1240_v38, %v3018_v48  ;;  %v1990_v48 = vld [vmem:[%s3284_s7 + $0x110] sm:$0xff]  ;;  %v2019_v38 = vld [vmem:[%s3284_s7 + $0x140] sm:$0xff] }
 0xc15   :  { %v2521_v51 = vpack.c.bf16 %v1991_v50, %v1990_v48 }
 0xc16   :  { %v3114_v41 = vmul.f32 %v1972_v39, %v3111_v40  ;;  %v2020_v39 = vld [vmem:[%s3284_s7 + $0x148] sm:$0xff] }
 0xc18   :  { %2326 = vmatmul.mubr.msk.f32.vlgmr.msra.gmra.mrb[12].mxu0 %vm70_vm1, %v3114_v41 }
 0xc19   :  { %2363 = vmatprep.mubr.msk.f32.mxu0 %vm2623_vm0, %v2622_v3  ;;  %2519 = vmatpush3.bf16.msra.mxu0 %v2518_v49 }
 0xc1a   :  { %2520 = vmatprep.subr.bf16.mxu0 %v2624_v8 }
 0xc1d   :  { %2522 = vmatpush3.bf16.msra.mxu0 %v2521_v51 }
 0xc1e   :  { %2523 = vmatprep.subr.bf16.mxu0 %v2624_v8 }
 0xc21   :  { %2525 = vmatpush3.bf16.msra.mxu0 %v2524_v54  ;;  %v2551_v54 = vpack.c.bf16 %v2026_v53, %v2025_v52 }
 0xc22   :  { %2526 = vmatprep.subr.bf16.mxu0 %v2624_v8 }
 0xc25   :  { %2528 = vmatpush3.bf16.msra.mxu0 %v2527_v63 }
 0xc26   :  { %2529 = vmatprep.subr.bf16.mxu0 %v2624_v8 }
 0xceb   :  { %v1337_v57 = vpop.f32.mrb[12].mxu0 }
 0xcec   :  { %v1338_v58 = vadd.f32 %v1975_v55, %v1337_v57  ;;  %v2327_v59 = vpop.f32.mrb[13].mxu0 }
 0xcee   :  { %v1341_v60 = vmax.f32 %v1338_v58, 0.0 }
 0xcf0   :  { %2345 = vmatmul.mubr.msk.f32.vlgmr.msra.gmra.mrb[12].mxu1 %vm160_vm2, %v1341_v60  ;;  %v2028_v60 = vld [vmem:[%s3285_s8 + $0x5] ss:$0 sm:$0xff] }
 0xcf1   :  { %2368 = vmatprep.mubr.msk.f32.mxu1 %vm2623_vm0, %v2622_v3  ;;  %2367 = vmatpush3.msra.mxu1 %v2004_v7  ;;  %v344_v7 = vpop.xlane.xlu1 %343 }
 0xcf2   :  { %2541 = vmatprep.subr.bf16.mxu1 %v2624_v8 }
 0xdc3   :  { %v1428_v2 = vpop.f32.mrb[12].mxu1 }
 0xdc4   :  { %v1429_v5 = vadd.f32 %v1986_v0, %v1428_v2  ;;  %v2346_v1 = vpop.f32.mrb[13].mxu1 }
 0xdc6   :  { %v1432_v6 = vmax.f32 %v1429_v5, 0.0 }
 0xdc8   :  { %2364 = vmatmul.mubr.msk.f32.vlgmr.msra.gmra.mrb[14].mxu0 %vm160_vm2, %v1432_v6 }
 0xdc9   :  { %2387 = vmatprep.mubr.msk.f32.mxu0 %vm2623_vm0, %v2622_v3  ;;  %2531 = vmatpush3.bf16.msra.mxu0 %v2530_v20 }
 0xdca   :  { %2532 = vmatprep.subr.bf16.mxu0 %v2624_v8 }
 0xdcd   :  { %2534 = vmatpush3.bf16.msra.mxu0 %v2533_v21 }
 0xdce   :  { %2535 = vmatprep.subr.bf16.mxu0 %v2624_v8 }
 0xdd1   :  { %2537 = vmatpush3.bf16.msra.mxu0 %v2536_v24 }
 0xdd2   :  { %2538 = vmatprep.subr.bf16.mxu0 %v2624_v8 }
 0xdd5   :  { %2540 = vmatpush3.bf16.msra.mxu0 %v2539_v36 }
 0xe9b   :  { %v1519_v9 = vpop.f32.mrb[14].mxu0 }
 0xe9c   :  { %v1520_v10 = vadd.f32 %v1997_v4, %v1519_v9  ;;  %v2365_v11 = vpop.f32.mrb[15].mxu0  ;;  %v1244_v9 = vpop.xlane.xlu1 %1243 }
 0xe9d   :  { %v2030_v11 = vld [vmem:[%s3279_s2 + $0x5] ss:$0 sm:$0xff] }
 0xe9e   :  { %1530 = vrot.lane.b32.xlu0 %v1520_v10, %s2625_s17  ;;  %2575 = vtanh.f32 %v1520_v10 }
 0xea8   :  { %v2576_v13 = vpop.eup %2575 }
 0xea9   :  { %v1525_v16 = vmul.f32 %v2576_v13, %v1524_v14 }
 0xeab   :  { %v1542_v17 = vsel %vm70_vm1, %v1525_v16, 0.0  ;;  %v1526_v25 = vmul.f32 1.442695, %v1525_v16 }
 0xead   :  { %2577 = vpow2.f32 %v1526_v25 }
 0xeb7   :  { %v2578_v26 = vpop.eup %2577 }
 0xeb8   :  { %v1528_v56 = vmul.f32 %v2578_v26, %v3111_v40  ;;  %v2542_v40 = vpack.c.bf16 %v2020_v39, %v2019_v38 }
 0xebd   :  { %643 = vadd.xlane.f32.xlu0 %v642_v12 }
 0xec1   :  { %943 = vadd.xlane.f32.xlu0 %v942_v15 }
 0xec5   :  { %1543 = vadd.xlane.f32.xlu0 %v1542_v17 }
 0xf10   :  { %v1531_v28 = vpop.permute.xlu0 %1530 }
 0xf11   :  { %v1533_v29 = vadd.f32 %v1531_v28, %v1528_v56 }
 0xf13   :  { %v1540_v30 = vmul.f32 %v1999_v27, %v1533_v29 }
 0xf15   :  { %v1541_v32 = vadd.f32 %v1540_v30, %v3114_v41  ;;  %v2022_v41 = vld [vmem:[%s3284_s7 + $0x158] sm:$0xff] }
 0xf17   :  { %v1557_v33 = vmul.f32 %v2003_v31, %v1541_v32 }
 0xf19   :  { %2369 = vmatmul.mubr.msk.f32.vlgmr.msra.gmra.mrb[14].mxu1 %vm70_vm1, %v1557_v33 }
 0xf1a   :  { %2406 = vmatprep.mubr.msk.f32.mxu1 %vm2623_vm0, %v2622_v3  ;;  %v2021_v3 = vld [vmem:[%s3284_s7 + $0x150] sm:$0xff]  ;;  %2543 = vmatpush3.bf16.msra.mxu1 %v2542_v40  ;;  %s2002_s7 = sld [smem:[#allocation2 + $0x5]] }
 0xf1b   :  { %v2545_v42 = vpack.c.bf16 %v2022_v41, %v2021_v3  ;;  %2544 = vmatprep.subr.bf16.mxu1 %v2624_v8 }
 0xf1e   :  { %2546 = vmatpush3.bf16.msra.mxu1 %v2545_v42 }
 0xf1f   :  { %2547 = vmatprep.subr.bf16.mxu1 %v2624_v8 }
 0xf20   :  { %v1824_v0 = vstv %s2002_s7 }
 0xf22   :  { %2549 = vmatpush3.bf16.msra.mxu1 %v2548_v45 }
 0xf23   :  { %2550 = vmatprep.subr.bf16.mxu1 %v2624_v8  ;;  %v2017_v8 = vld [vmem:[%s3283_s6 + $0x5] ss:$0 sm:$0xff] }
 0xf26   :  { %2552 = vmatpush3.bf16.msra.mxu1 %v2551_v54 }
 0xfec   :  { %v1637_v48 = vpop.f32.mrb[14].mxu1 }
 0xfed   :  { %v1638_v49 = vadd.f32 %v2006_v47, %v1637_v48  ;;  %v2370_v50 = vpop.f32.mrb[15].mxu1 }
 0xfef   :  { %v1641_v51 = vmax.f32 %v1638_v49, 0.0 }
 0xff1   :  { %2388 = vmatmul.mubr.msk.f32.vlgmr.msra.gmra.mrb[16].mxu0 %vm160_vm2, %v1641_v51 }
0x10c4   :  { %v1728_v55 = vpop.f32.mrb[16].mxu0 }
0x10c5   :  { %v1729_v57 = vadd.f32 %v2017_v8, %v1728_v55  ;;  %v2389_v58 = vpop.f32.mrb[17].mxu0 }
0x10c7   :  { %v1732_v59 = vmax.f32 %v1729_v57, 0.0 }
0x10c9   :  { %2407 = vmatmul.mubr.msk.f32.vlgmr.msra.gmra.mrb[16].mxu1 %vm160_vm2, %v1732_v59 }
0x119c   :  { %v1819_v61 = vpop.f32.mrb[16].mxu1 }
0x119d   :  { %v1820_v62 = vadd.f32 %v2028_v60, %v1819_v61  ;;  %v2408_v63 = vpop.f32.mrb[17].mxu1 }
0x119f   :  { %2579 = vtanh.f32 %v1820_v62  ;;  %1830 = vrot.lane.b32.xlu1 %v1820_v62, %s2625_s17  ;;  %s2626_s17 = smov [#allocation5]  }
0x11a0   :  { %s1855_s24 = sshll.u32 %s2626_s17, 4  ;;  %s1856_s24 = int_to_ptr.vmem [resolvable:$true] %s1855_s24 }
0x11a1   :  { %s2595_s25 = scalar_lea.vmem %s1856_s24, 128  ;;  %p2600_p6 = scmp.lt.s32.totalorder %s1856_s24, %s1856_s24 }
0x11a2   :  { %p2596_p5 = scmp.ne.s32.totalorder %s1856_s24, %s2595_s25  ;;  %p2601_p7 = scmp.lt.s32.totalorder %s2595_s25, %s2595_s25 }
0x11a4   :  { %p2602_p8 = por %p2601_p7, %p2600_p6 }
0x11a6   :  { %p2603_p9 = pnand %p2602_p8, %p2596_p5 }
0x11a9   :  { %v2580_v2 = vpop.eup %2579 }
0x11aa   :  { %v1825_v5 = vmul.f32 %v2580_v2, %v1824_v0 }
0x11ac   :  { %v1842_v1 = vsel %vm70_vm1, %v1825_v5, 0.0  ;;  %v1826_v6 = vmul.f32 1.442695, %v1825_v5 }
0x11ad   :  { %1843 = vadd.xlane.f32.xlu0 %v1842_v1 }
0x11ae   :  { %2581 = vpow2.f32 %v1826_v6 }
0x11b8   :  { %v2582_v4 = vpop.eup %2581 }
0x11b9   :  { %v1828_v10 = vmul.f32 %v2582_v4, %v1541_v32 }
0x1211   :  { %v1831_v12 = vpop.permute.xlu1 %1830 }
0x1212   :  { %v1833_v13 = vadd.f32 %v1831_v12, %v1828_v10 }
0x1214   :  { %v1840_v14 = vmul.f32 %v2030_v11, %v1833_v13 }
0x1216   :  { %v1841_v15 = vadd.f32 %v1840_v14, %v1557_v33 }
0x1218   :  { %1846 = vst.msk [vmem:[#allocation5] sm:$0xff] %vm70_vm1, %v1841_v15 }
0x1219   :  { %2606 = shalt.err (!%p2603_p9)
}
0x121a   :  { %s2607_s2 = scalar_lea.hbm %s3287_s10, 128 }
0x121b   :  { %p2608_p10 = scmp.ne.s32.totalorder %s3287_s10, %s2607_s2  ;;  %p2611_p11 = scmp.lt.u32.totalorder %s2607_s2, %s3287_s10 }
0x121d   :  { %p2613_p12 = pnand %p2611_p11, %p2608_p10 }
0x121f   :  { %2616 = shalt.err (!%p2613_p12)
}
0x1220   :  { %1858 = dma.vmem_to_hbm [thread:$0]  %s1856_s24, 128, %s3287_s10, [#allocation3]   ;;  %v644_v16 = vpop.xlane.xlu0 %643  ;;  %vm1847_vm3 = vcmask 7168  }
0x1221   :  { %v645_v18 = vadd.f32 %v644_v16, %v344_v7 }
0x1224   :  { %v944_v17 = vpop.xlane.xlu0 %943 }
0x1225   :  { %v945_v19 = vadd.f32 %v944_v17, %v645_v18 }
0x1227   :  { %v1245_v46 = vadd.f32 %v1244_v9, %v945_v19 }
0x1228   :  { %v1544_v20 = vpop.xlane.xlu0 %1543 }
0x1229   :  { %v1545_v37 = vadd.f32 %v1544_v20, %v1245_v46 }
0x123a   :  { %v1844_v21 = vpop.xlane.xlu0 %1843 }
0x123b   :  { %v1845_v22 = vadd.f32 %v1844_v21, %v1545_v37 }
0x123d   :  { %1848 = vst.msk [vmem:[%s3288_s11] sm:$0xff] %vm1847_vm3, %v1845_v22 }
0x123e   :  { %2619 = dma.done.wait [#allocation3], 128  }
0x123f   :  { %2620 = vsyncadd [#allocation3], 4294967168 }
0x1240   :  { %1866 = vsyncpa [#allocation3], 1 }
0x1241   :  { %1867 = vsyncpa [#allocation4], 1 }

</bundles_post_ra>
